<compile_context>
chip_gen: v7x
topology: tpu7x:2x2x1
jax: 0.10.0
libtpu: 0.0.40
codegen_flags: <defaults>
</compile_context>

<pallas_src>
import jax
import jax.numpy as jnp
import numpy as np
from jax.experimental import pallas as pl
from jax.experimental.pallas import tpu as pltpu


# ---------------------------------------------------------------------------
# One-time parameter packing (hoisted out of the per-call path).
# ---------------------------------------------------------------------------
def pack_params(params, U, *, compute_dtype=jnp.bfloat16):
    cdt = compute_dtype
    c_in, h1 = params['w0'].shape
    h2 = params['w2'].shape[1]
    lane_in = U * c_in
    lane_in_pad = ((lane_in + 127) // 128) * 128      # pad first-layer lanes to full vregs

    def bdiag(w):
        # (ci, co) -> (U*ci, U*co): U copies of the 1x1-conv weight on the diagonal.
        ci, co = w.shape
        eye = jnp.eye(U, dtype=jnp.float32)
        return (eye[:, None, :, None] * w.astype(jnp.float32)[None, :, None, :]
                ).reshape(U * ci, U * co)

    def tile_row(v):
        # per-channel row (1, c) -> fused-lane row (1, U*c)  (u-major, c-minor)
        return jnp.tile(v.astype(jnp.float32), (1, U))

    w0_bd = jnp.pad(bdiag(params['w0']), ((0, lane_in_pad - lane_in), (0, 0))).astype(cdt)
    w1_bd = bdiag(params['w1']).astype(cdt)
    # Heads: columns permuted so all mu lanes come first: [blockdiag(w2) | blockdiag(w3)].
    w23_bd = jnp.concatenate([bdiag(params['w2']), bdiag(params['w3'])], axis=1).astype(cdt)

    return dict(
        w0_bd=w0_bd,
        b0_t=tile_row(params['b0']),
        w1_bd=w1_bd,
        b1_t=tile_row(params['b1']),
        bn_s_t=tile_row(params['bn_scale']),
        bn_b_t=tile_row(params['bn_shift']),
        w23_bd=w23_bd,
        b23_t=jnp.concatenate([tile_row(params['b2']), tile_row(params['b3'])], axis=1),
        # constants for the mu-lane -> (U, h2) de-interleave (mask-mul + selection matmul)
        bmask=jnp.repeat(jnp.eye(U, dtype=jnp.float32), h2, axis=1),     # (U, U*h2)
        sel=jnp.tile(jnp.eye(h2, dtype=jnp.float32), (U, 1)),            # (U*h2, h2)
    )


def _pick_batch_block(N):
    """Fill the MXU M-dim when possible but keep >=2 grid steps (v7x has 2 TCs)."""
    bb = min(N, 16)
    while N % bb:
        bb -= 1
    if N > 1 and N // bb < 2:
        bb = N // 2
        while N % bb:
            bb -= 1
    return max(bb, 1)


# ---------------------------------------------------------------------------
# Forward pass.
# ---------------------------------------------------------------------------
def gcnvae_forward(x, A, packed, *, batch_block=None):
    """x: (N, C_in, U, V) NCHW; A: (N, V, V). Returns (sigmoid(z z^T), mu, logvar)."""
    N, C_in, U, V = x.shape
    assert U == V == A.shape[1] == A.shape[2]
    cdt = packed['w0_bd'].dtype
    h1 = packed['bn_s_t'].shape[1] // U
    h2 = packed['sel'].shape[1]
    UH1, UH2 = U * h1, U * h2
    lane_in = U * C_in
    lane_in_pad = packed['w0_bd'].shape[0]

    BB = _pick_batch_block(N) if batch_block is None else batch_block
    assert N % BB == 0, "batch_block must divide the batch size"

    # activation layout: act[n, v, u*C + c] == torch act[n, c, u, v]
    x2 = jnp.transpose(x, (0, 3, 2, 1)).reshape(N, V, lane_in)
    if lane_in_pad > lane_in:
        x2 = jnp.pad(x2, ((0, 0), (0, 0), (0, lane_in_pad - lane_in)))
    x2 = x2.astype(cdt)
    At = jnp.swapaxes(A, 1, 2).astype(cdt)                                # At[n,w,v] = A[n,v,w]
    a_mean = jnp.mean(A, axis=-1, keepdims=True).astype(jnp.float32)      # (N, V, 1), f32

    def kernel(x_ref, at_ref, am_ref, w0_ref, b0_ref, w1_ref, b1_ref,
               bns_ref, bnb_ref, w23_ref, b23_ref, bmask_ref, sel_ref,
               heads_ref, adec_ref):
        mxu_dt = w0_ref.dtype
        at = at_ref[...]                               # (BB, V, V), MXU dtype
        bn_s = bns_ref[...]                            # (1, U*h1), f32
        bn_b = bnb_ref[...]

        def chan_mm(h3, w_ref, b_ref):
            # 1x1 conv over the fused (u, c) lanes via a block-diagonal weight.
            rows = h3.reshape(BB * V, h3.shape[-1]).astype(mxu_dt)
            out = jnp.dot(rows, w_ref[...],
                          preferred_element_type=jnp.float32) + b_ref[...]
            return out.reshape(BB, V, out.shape[-1])

        def node_mix(hc3):
            # out[b, w, k] = sum_v A[b, v, w] * hc[b, v, k]   (lane-dense matmul)
            return jnp.einsum('bwv,bvk->bwk', at, hc3.astype(mxu_dt),
                              preferred_element_type=jnp.float32)

        # gc0 -> BN (eval) -> dropout(identity) -> relu
        h = node_mix(chan_mm(x_ref[...], w0_ref, b0_ref))
        h = jnp.maximum(h * bn_s + bn_b, 0.0)
        # gc1 -> BN (same module reused, as in the PyTorch code) -> relu
        h = node_mix(chan_mm(h, w1_ref, b1_ref))
        h = jnp.maximum(h * bn_s + bn_b, 0.0)           # (BB, V, U*h1), f32

        # mu/logvar heads: fold mean over w and reduce over v BEFORE the head matmul:
        #   mean_w sum_v hc[v] A[v,w]      = sum_v hc[v] * mean_w A[v,w]
        #   sum_v a[v] * (h[v] @ W + b)    = (sum_v a[v] h[v]) @ W + (sum_v a[v]) * b
        am = am_ref[...]                                # (BB, V, 1), f32 (from f32 A)
        hbar = jnp.sum(h * am, axis=1)                  # (BB, U*h1)
        asum = jnp.sum(am, axis=1)                      # (BB, 1)
        heads = (jnp.dot(hbar.astype(mxu_dt), w23_ref[...],
                         preferred_element_type=jnp.float32)
                 + asum * b23_ref[...])                 # (BB, U*2*h2), mu lanes first
        heads_ref[:, 0, :] = heads                      # lane-dense (512-wide) slab store

        # Inner-product decoder on z = mu (eval mode).  De-interleave the contiguous
        # mu slab into (BB, U, h2) with one sublane-broadcast * block-mask and one
        # tiny selection matmul (no lane-offset store loop, no output-ref round trip).
        mu_flat = heads[:, :UH2]                        # (BB, U*h2), f32
        masked = mu_flat[:, None, :] * bmask_ref[...]   # (BB, U, U*h2)
        z = jnp.dot(masked.reshape(BB * U, UH2), sel_ref[...],
                    preferred_element_type=jnp.float32).reshape(BB, U, h2)
        logits = jnp.einsum('bic,bjc->bij', z, z,
                            preferred_element_type=jnp.float32)   # (BB, U, U)
        adec_ref[...] = jax.nn.sigmoid(logits)

    def wspec(shape):
        return pl.BlockSpec(shape, lambda n: (0,) * len(shape))   # fetched once, stays resident

    in_specs = [
        pl.BlockSpec((BB, V, lane_in_pad), lambda n: (n, 0, 0)),   # x (fused, padded lanes)
        pl.BlockSpec((BB, V, V), lambda n: (n, 0, 0)),             # A^T
        pl.BlockSpec((BB, V, 1), lambda n: (n, 0, 0)),             # mean_w A (f32)
        wspec((lane_in_pad, UH1)), wspec((1, UH1)),                # gc0 (block-diag)
        wspec((UH1, UH1)), wspec((1, UH1)),                        # gc1 (block-diag)
        wspec((1, UH1)), wspec((1, UH1)),                          # BN scale / shift
        wspec((UH1, 2 * UH2)), wspec((1, 2 * UH2)),                # gc2|gc3 heads
        wspec((U, UH2)), wspec((UH2, h2)),                         # de-interleave constants
    ]
    out_specs = [
        pl.BlockSpec((BB, 1, 2 * UH2), lambda n: (n, 0, 0)),       # mu|logvar slab
        pl.BlockSpec((BB, U, U), lambda n: (n, 0, 0)),             # decoded adjacency
    ]
    out_shape = (
        jax.ShapeDtypeStruct((N, 1, 2 * UH2), jnp.float32),
        jax.ShapeDtypeStruct((N, U, U), jnp.float32),
    )
    grid_spec = pltpu.PrefetchScalarGridSpec(
        num_scalar_prefetch=0, grid=(N // BB,),
        in_specs=in_specs, out_specs=out_specs)

    heads, adec = pl.pallas_call(
        kernel,
        grid_spec=grid_spec,
        out_shape=out_shape,
        compiler_params=pltpu.CompilerParams(dimension_semantics=("parallel",)),
    )(x2, At, a_mean,
      packed['w0_bd'], packed['b0_t'], packed['w1_bd'], packed['b1_t'],
      packed['bn_s_t'], packed['bn_b_t'], packed['w23_bd'], packed['b23_t'],
      packed['bmask'], packed['sel'])

    mu = heads[:, 0, :UH2].reshape(N, U, h2)
    logvar = heads[:, 0, UH2:].reshape(N, U, h2)
    return adec, mu, logvar


# ---------------------------------------------------------------------------
# Parameters / pure-JAX reference (mirrors the PyTorch module in eval mode).
# ---------------------------------------------------------------------------
def init_params(key, c_in, h1, h2):
    ks = jax.random.split(key, 12)

    def lin(k, fi, fo):
        return (jax.random.normal(k, (fi, fo), jnp.float32) / np.sqrt(fi)).astype(jnp.float32)

    params = dict(
        w0=lin(ks[0], c_in, h1), b0=0.1 * jax.random.normal(ks[1], (1, h1), jnp.float32),
        w1=lin(ks[2], h1, h1),   b1=0.1 * jax.random.normal(ks[3], (1, h1), jnp.float32),
        w2=lin(ks[4], h1, h2),   b2=0.1 * jax.random.normal(ks[5], (1, h2), jnp.float32),
        w3=lin(ks[6], h1, h2),   b3=0.1 * jax.random.normal(ks[7], (1, h2), jnp.float32),
    )
    # BatchNorm2d (inference) folded into per-channel scale/shift.
    gamma = 1.0 + 0.1 * jax.random.normal(ks[8], (h1,), jnp.float32)
    beta = 0.1 * jax.random.normal(ks[9], (h1,), jnp.float32)
    rmean = 0.1 * jax.random.normal(ks[10], (h1,), jnp.float32)
    rvar = jnp.abs(jax.random.normal(ks[11], (h1,), jnp.float32)) + 0.5
    eps = 1e-5
    scale = gamma / jnp.sqrt(rvar + eps)
    shift = beta - rmean * scale
    params['bn_scale'] = scale.reshape(1, h1)
    params['bn_shift'] = shift.reshape(1, h1)
    return params


def ref_forward(x, A, p):
    hp = jax.lax.Precision.HIGHEST

    def gconv(h, w, b):
        hc = jnp.einsum('ncuv,co->nouv', h, w, precision=hp) + b[0][None, :, None, None]
        return jnp.einsum('ncuv,nvw->ncuw', hc, A, precision=hp)

    s = p['bn_scale'][0][None, :, None, None]
    t = p['bn_shift'][0][None, :, None, None]
    h = jnp.maximum(gconv(x, p['w0'], p['b0']) * s + t, 0.0)
    h = jnp.maximum(gconv(h, p['w1'], p['b1']) * s + t, 0.0)
    mu = gconv(h, p['w2'], p['b2']).mean(-1).transpose(0, 2, 1)
    lv = gconv(h, p['w3'], p['b3']).mean(-1).transpose(0, 2, 1)
    z = mu  # parameterize, eval mode
    adec = jax.nn.sigmoid(jnp.einsum('nuc,nvc->nuv', z, z, precision=hp))
    return adec, mu, lv


if __name__ == "__main__":
    N, C_in, U = 2, 4, 16          # batch, in_channels, nodes (x is N x C x U x U)
    h1, h2 = 32, 16                # args['h_dim1'], args['h_dim2']

    key = jax.random.PRNGKey(0)
    kx, ka, kp = jax.random.split(key, 3)
    x = jax.random.normal(kx, (N, C_in, U, U), jnp.float32)
    A_raw = jax.random.uniform(ka, (N, U, U), jnp.float32)
    A = A_raw / jnp.sum(A_raw, axis=-1, keepdims=True)   # row-normalized adjacency-like matrix
    params = init_params(kp, C_in, h1, h2)

    adec_r, mu_r, lv_r = ref_forward(x, A, params)

    # Default path: bf16 MXU operands, f32 accumulation / epilogue (fast on all generations).
    packed_bf16 = pack_params(params, U)                    # packed once, reused across calls
    adec, mu, logvar = jax.block_until_ready(gcnvae_forward(x, A, packed_bf16))
    assert adec.shape == (N, U, U) and mu.shape == (N, U, h2) and logvar.shape == (N, U, h2)
    assert np.allclose(np.asarray(adec), np.asarray(adec_r), atol=5e-2, rtol=5e-2)
    assert np.allclose(np.asarray(mu), np.asarray(mu_r), atol=5e-2, rtol=5e-2)
    assert np.allclose(np.asarray(logvar), np.asarray(lv_r), atol=5e-2, rtol=5e-2)

    # f32 operand path (strict tolerance).
    packed_f32 = pack_params(params, U, compute_dtype=jnp.float32)
    adec32, mu32, lv32 = jax.block_until_ready(gcnvae_forward(x, A, packed_f32))
    assert np.allclose(np.asarray(adec32), np.asarray(adec_r), atol=2e-2, rtol=2e-2)
    assert np.allclose(np.asarray(mu32), np.asarray(mu_r), atol=2e-2, rtol=2e-2)
    assert np.allclose(np.asarray(lv32), np.asarray(lv_r), atol=2e-2, rtol=2e-2)

    print("KERNEL_OK")
</pallas_src>

<mosaic_0001>
module attributes {stable_mosaic.version = 11 : i64} {
  func.func @kernel(%arg0: i32, %arg1: memref<1x16x128xbf16, #tpu.memory_space<vmem>>, %arg2: memref<1x16x16xbf16, #tpu.memory_space<vmem>>, %arg3: memref<1x16x1xf32, #tpu.memory_space<vmem>>, %arg4: memref<128x512xbf16, #tpu.memory_space<vmem>>, %arg5: memref<1x512xf32, #tpu.memory_space<vmem>>, %arg6: memref<512x512xbf16, #tpu.memory_space<vmem>>, %arg7: memref<1x512xf32, #tpu.memory_space<vmem>>, %arg8: memref<1x512xf32, #tpu.memory_space<vmem>>, %arg9: memref<1x512xf32, #tpu.memory_space<vmem>>, %arg10: memref<512x512xbf16, #tpu.memory_space<vmem>>, %arg11: memref<1x512xf32, #tpu.memory_space<vmem>>, %arg12: memref<16x256xf32, #tpu.memory_space<vmem>>, %arg13: memref<256x16xf32, #tpu.memory_space<vmem>>, %arg14: memref<1x1x512xf32, #tpu.memory_space<vmem>>, %arg15: memref<1x16x16xf32, #tpu.memory_space<vmem>>) attributes {dimension_semantics = [#tpu.dimension_semantics<parallel>], iteration_bounds = array<i64: 2>, scalar_prefetch = 0 : i64, scratch_operands = 0 : i64, tpu.core_type = #tpu.core_type<tc>, window_params = [{transform_indices = @transform_0, window_bounds = array<i64: 1, 16, 128>}, {transform_indices = @transform_1, window_bounds = array<i64: 1, 16, 16>}, {transform_indices = @transform_2, window_bounds = array<i64: 1, 16, 1>}, {pipeline_mode = #tpu.pipeline_mode<synchronous>, transform_indices = @transform_3, window_bounds = array<i64: 128, 512>}, {pipeline_mode = #tpu.pipeline_mode<synchronous>, transform_indices = @transform_4, window_bounds = array<i64: 1, 512>}, {pipeline_mode = #tpu.pipeline_mode<synchronous>, transform_indices = @transform_5, window_bounds = array<i64: 512, 512>}, {pipeline_mode = #tpu.pipeline_mode<synchronous>, transform_indices = @transform_6, window_bounds = array<i64: 1, 512>}, {pipeline_mode = #tpu.pipeline_mode<synchronous>, transform_indices = @transform_7, window_bounds = array<i64: 1, 512>}, {pipeline_mode = #tpu.pipeline_mode<synchronous>, transform_indices = @transform_8, window_bounds = array<i64: 1, 512>}, {pipeline_mode = #tpu.pipeline_mode<synchronous>, transform_indices = @transform_9, window_bounds = array<i64: 512, 512>}, {pipeline_mode = #tpu.pipeline_mode<synchronous>, transform_indices = @transform_10, window_bounds = array<i64: 1, 512>}, {pipeline_mode = #tpu.pipeline_mode<synchronous>, transform_indices = @transform_11, window_bounds = array<i64: 16, 256>}, {pipeline_mode = #tpu.pipeline_mode<synchronous>, transform_indices = @transform_12, window_bounds = array<i64: 256, 16>}, {transform_indices = @transform_13, window_bounds = array<i64: 1, 1, 512>}, {transform_indices = @transform_14, window_bounds = array<i64: 1, 16, 16>}]} {
    %c0 = arith.constant 0 : index
    %c0_0 = arith.constant 0 : index
    %c0_1 = arith.constant 0 : index
    %0 = vector.load %arg2[%c0, %c0_0, %c0_1] : memref<1x16x16xbf16, #tpu.memory_space<vmem>>, vector<1x16x16xbf16>
    %c0_2 = arith.constant 0 : index
    %c0_3 = arith.constant 0 : index
    %1 = vector.load %arg8[%c0_2, %c0_3] : memref<1x512xf32, #tpu.memory_space<vmem>>, vector<1x512xf32>
    %c0_4 = arith.constant 0 : index
    %c0_5 = arith.constant 0 : index
    %2 = vector.load %arg9[%c0_4, %c0_5] : memref<1x512xf32, #tpu.memory_space<vmem>>, vector<1x512xf32>
    %c0_6 = arith.constant 0 : index
    %c0_7 = arith.constant 0 : index
    %c0_8 = arith.constant 0 : index
    %3 = vector.load %arg1[%c0_6, %c0_7, %c0_8] : memref<1x16x128xbf16, #tpu.memory_space<vmem>>, vector<1x16x128xbf16>
    %4 = vector.shape_cast %3 : vector<1x16x128xbf16> to vector<16x128xbf16>
    %c0_9 = arith.constant 0 : index
    %c0_10 = arith.constant 0 : index
    %5 = vector.load %arg4[%c0_9, %c0_10] : memref<128x512xbf16, #tpu.memory_space<vmem>>, vector<128x512xbf16>
    %cst = arith.constant dense<0.000000e+00> : vector<16x512xf32>
    %6 = tpu.matmul %4, %5, %cst {dimension_numbers = #tpu.dot_dimension_numbers<[1], [0], [0], [1], [0, 0, 1, 1], [], []>} : vector<16x128xbf16>, vector<128x512xbf16>, vector<16x512xf32> -> vector<16x512xf32>
    %c0_11 = arith.constant 0 : index
    %c0_12 = arith.constant 0 : index
    %7 = vector.load %arg5[%c0_11, %c0_12] : memref<1x512xf32, #tpu.memory_space<vmem>>, vector<1x512xf32>
    %8 = vector.broadcast %7 : vector<1x512xf32> to vector<16x512xf32>
    %9 = arith.addf %6, %8 : vector<16x512xf32>
    %10 = vector.shape_cast %9 : vector<16x512xf32> to vector<1x16x512xf32>
    %11 = arith.truncf %10 : vector<1x16x512xf32> to vector<1x16x512xbf16>
    "tpu.trace_start"() <{level = 10 : i32, message = "bwv,bvk->bwk"}> : () -> ()
    %cst_13 = arith.constant dense<0.000000e+00> : vector<1x16x512xf32>
    %12 = tpu.matmul %0, %11, %cst_13 {dimension_numbers = #tpu.dot_dimension_numbers<[2], [1], [1], [2], [0, 0, 0, 1, 1, 2], [0], [0]>} : vector<1x16x16xbf16>, vector<1x16x512xbf16>, vector<1x16x512xf32> -> vector<1x16x512xf32>
    "tpu.trace_stop"() : () -> ()
    %13 = vector.shape_cast %1 : vector<1x512xf32> to vector<1x1x512xf32>
    %14 = vector.broadcast %13 : vector<1x1x512xf32> to vector<1x16x512xf32>
    %15 = arith.mulf %12, %14 : vector<1x16x512xf32>
    %16 = vector.shape_cast %2 : vector<1x512xf32> to vector<1x1x512xf32>
    %17 = vector.broadcast %16 : vector<1x1x512xf32> to vector<1x16x512xf32>
    %18 = arith.addf %15, %17 : vector<1x16x512xf32>
    %cst_14 = arith.constant 0.000000e+00 : f32
    %19 = vector.broadcast %cst_14 : f32 to vector<1x16x512xf32>
    %20 = arith.maximumf %18, %19 : vector<1x16x512xf32>
    %21 = vector.shape_cast %20 : vector<1x16x512xf32> to vector<16x512xf32>
    %22 = arith.truncf %21 : vector<16x512xf32> to vector<16x512xbf16>
    %c0_15 = arith.constant 0 : index
    %c0_16 = arith.constant 0 : index
    %23 = vector.load %arg6[%c0_15, %c0_16] : memref<512x512xbf16, #tpu.memory_space<vmem>>, vector<512x512xbf16>
    %cst_17 = arith.constant dense<0.000000e+00> : vector<16x512xf32>
    %24 = tpu.matmul %22, %23, %cst_17 {dimension_numbers = #tpu.dot_dimension_numbers<[1], [0], [0], [1], [0, 0, 1, 1], [], []>} : vector<16x512xbf16>, vector<512x512xbf16>, vector<16x512xf32> -> vector<16x512xf32>
    %c0_18 = arith.constant 0 : index
    %c0_19 = arith.constant 0 : index
    %25 = vector.load %arg7[%c0_18, %c0_19] : memref<1x512xf32, #tpu.memory_space<vmem>>, vector<1x512xf32>
    %26 = vector.broadcast %25 : vector<1x512xf32> to vector<16x512xf32>
    %27 = arith.addf %24, %26 : vector<16x512xf32>
    %28 = vector.shape_cast %27 : vector<16x512xf32> to vector<1x16x512xf32>
    %29 = arith.truncf %28 : vector<1x16x512xf32> to vector<1x16x512xbf16>
    "tpu.trace_start"() <{level = 10 : i32, message = "bwv,bvk->bwk"}> : () -> ()
    %cst_20 = arith.constant dense<0.000000e+00> : vector<1x16x512xf32>
    %30 = tpu.matmul %0, %29, %cst_20 {dimension_numbers = #tpu.dot_dimension_numbers<[2], [1], [1], [2], [0, 0, 0, 1, 1, 2], [0], [0]>} : vector<1x16x16xbf16>, vector<1x16x512xbf16>, vector<1x16x512xf32> -> vector<1x16x512xf32>
    "tpu.trace_stop"() : () -> ()
    %31 = vector.shape_cast %1 : vector<1x512xf32> to vector<1x1x512xf32>
    %32 = vector.broadcast %31 : vector<1x1x512xf32> to vector<1x16x512xf32>
    %33 = arith.mulf %30, %32 : vector<1x16x512xf32>
    %34 = vector.shape_cast %2 : vector<1x512xf32> to vector<1x1x512xf32>
    %35 = vector.broadcast %34 : vector<1x1x512xf32> to vector<1x16x512xf32>
    %36 = arith.addf %33, %35 : vector<1x16x512xf32>
    %cst_21 = arith.constant 0.000000e+00 : f32
    %37 = vector.broadcast %cst_21 : f32 to vector<1x16x512xf32>
    %38 = arith.maximumf %36, %37 : vector<1x16x512xf32>
    %c0_22 = arith.constant 0 : index
    %c0_23 = arith.constant 0 : index
    %c0_24 = arith.constant 0 : index
    %39 = vector.load %arg3[%c0_22, %c0_23, %c0_24] : memref<1x16x1xf32, #tpu.memory_space<vmem>>, vector<1x16x1xf32>
    %40 = vector.broadcast %39 : vector<1x16x1xf32> to vector<1x16x512xf32>
    %41 = arith.mulf %38, %40 : vector<1x16x512xf32>
    %cst_25 = arith.constant dense<0.000000e+00> : vector<1x512xf32>
    %42 = vector.multi_reduction <add>, %41, %cst_25 [1] : vector<1x16x512xf32> to vector<1x512xf32>
    %cst_26 = arith.constant dense<0.000000e+00> : vector<1x1xf32>
    %43 = vector.multi_reduction <add>, %39, %cst_26 [1] : vector<1x16x1xf32> to vector<1x1xf32>
    %44 = arith.truncf %42 : vector<1x512xf32> to vector<1x512xbf16>
    %c0_27 = arith.constant 0 : index
    %c0_28 = arith.constant 0 : index
    %45 = vector.load %arg10[%c0_27, %c0_28] : memref<512x512xbf16, #tpu.memory_space<vmem>>, vector<512x512xbf16>
    %cst_29 = arith.constant dense<0.000000e+00> : vector<1x512xf32>
    %46 = tpu.matmul %44, %45, %cst_29 {dimension_numbers = #tpu.dot_dimension_numbers<[1], [0], [0], [1], [0, 0, 1, 1], [], []>} : vector<1x512xbf16>, vector<512x512xbf16>, vector<1x512xf32> -> vector<1x512xf32>
    %c0_30 = arith.constant 0 : index
    %c0_31 = arith.constant 0 : index
    %47 = vector.load %arg11[%c0_30, %c0_31] : memref<1x512xf32, #tpu.memory_space<vmem>>, vector<1x512xf32>
    %48 = vector.broadcast %43 : vector<1x1xf32> to vector<1x512xf32>
    %49 = arith.mulf %48, %47 : vector<1x512xf32>
    %50 = arith.addf %46, %49 : vector<1x512xf32>
    %c0_32 = arith.constant 0 : index
    %c0_33 = arith.constant 0 : index
    %c0_34 = arith.constant 0 : index
    %51 = vector.load %arg14[%c0_32, %c0_33, %c0_34] : memref<1x1x512xf32, #tpu.memory_space<vmem>>, vector<1x1x512xf32>
    %52 = vector.shape_cast %51 : vector<1x1x512xf32> to vector<1x512xf32>
    %53 = vector.shape_cast %50 : vector<1x512xf32> to vector<1x1x512xf32>
    tpu.vector_store %arg14[%c0_32, %c0_33, %c0_34], %53 {strides = array<i32>} : memref<1x1x512xf32, #tpu.memory_space<vmem>>, vector<1x1x512xf32>,
    %54 = vector.extract_strided_slice %50 {offsets = [0, 0], sizes = [1, 256], strides = [1, 1]} : vector<1x512xf32> to vector<1x256xf32>
    %55 = vector.shape_cast %54 : vector<1x256xf32> to vector<1x1x256xf32>
    %c0_35 = arith.constant 0 : index
    %c0_36 = arith.constant 0 : index
    %56 = vector.load %arg12[%c0_35, %c0_36] : memref<16x256xf32, #tpu.memory_space<vmem>>, vector<16x256xf32>
    %57 = vector.shape_cast %56 : vector<16x256xf32> to vector<1x16x256xf32>
    %58 = vector.broadcast %55 : vector<1x1x256xf32> to vector<1x16x256xf32>
    %59 = arith.mulf %58, %57 : vector<1x16x256xf32>
    %60 = vector.shape_cast %59 : vector<1x16x256xf32> to vector<16x256xf32>
    %c0_37 = arith.constant 0 : index
    %c0_38 = arith.constant 0 : index
    %61 = vector.load %arg13[%c0_37, %c0_38] : memref<256x16xf32, #tpu.memory_space<vmem>>, vector<256x16xf32>
    %cst_39 = arith.constant dense<0.000000e+00> : vector<16x16xf32>
    %62 = tpu.matmul %60, %61, %cst_39 {dimension_numbers = #tpu.dot_dimension_numbers<[1], [0], [0], [1], [0, 0, 1, 1], [], []>} : vector<16x256xf32>, vector<256x16xf32>, vector<16x16xf32> -> vector<16x16xf32>
    %63 = vector.shape_cast %62 : vector<16x16xf32> to vector<1x16x16xf32>
    "tpu.trace_start"() <{level = 10 : i32, message = "bic,bjc->bij"}> : () -> ()
    %cst_40 = arith.constant dense<0.000000e+00> : vector<1x16x16xf32>
    %64 = tpu.matmul %63, %63, %cst_40 {dimension_numbers = #tpu.dot_dimension_numbers<[2], [2], [1], [1], [0, 0, 0, 1, 1, 1], [0], [0]>} : vector<1x16x16xf32>, vector<1x16x16xf32>, vector<1x16x16xf32> -> vector<1x16x16xf32>
    "tpu.trace_stop"() : () -> ()
    %65 = arith.negf %64 : vector<1x16x16xf32>
    %66 = math.exp %65 : vector<1x16x16xf32>
    %cst_41 = arith.constant 1.000000e+00 : f32
    %67 = vector.broadcast %cst_41 : f32 to vector<1x16x16xf32>
    %68 = arith.addf %67, %66 : vector<1x16x16xf32>
    %69 = arith.divf %67, %68 : vector<1x16x16xf32>
    %c0_42 = arith.constant 0 : index
    %c0_43 = arith.constant 0 : index
    %c0_44 = arith.constant 0 : index
    %70 = vector.load %arg15[%c0_42, %c0_43, %c0_44] : memref<1x16x16xf32, #tpu.memory_space<vmem>>, vector<1x16x16xf32>
    tpu.vector_store %arg15[%c0_42, %c0_43, %c0_44], %69 {strides = array<i32>} : memref<1x16x16xf32, #tpu.memory_space<vmem>>, vector<1x16x16xf32>,
    return
  }
  func.func @transform_0(%arg0: i32) -> (i32, i32, i32) {
    %c0_i32 = arith.constant 0 : i32
    %c0_i32_0 = arith.constant 0 : i32
    %c0_i32_1 = arith.constant 0 : i32
    return %arg0, %c0_i32, %c0_i32_0 : i32, i32, i32
  }
  func.func @transform_1(%arg0: i32) -> (i32, i32, i32) {
    %c0_i32 = arith.constant 0 : i32
    %c0_i32_0 = arith.constant 0 : i32
    %c0_i32_1 = arith.constant 0 : i32
    return %arg0, %c0_i32, %c0_i32_0 : i32, i32, i32
  }
  func.func @transform_2(%arg0: i32) -> (i32, i32, i32) {
    %c0_i32 = arith.constant 0 : i32
    %c0_i32_0 = arith.constant 0 : i32
    %c0_i32_1 = arith.constant 0 : i32
    return %arg0, %c0_i32, %c0_i32_0 : i32, i32, i32
  }
  func.func @transform_3(%arg0: i32) -> (i32, i32) {
    %c0_i32 = arith.constant 0 : i32
    %c0_i32_0 = arith.constant 0 : i32
    %c0_i32_1 = arith.constant 0 : i32
    return %c0_i32, %c0_i32_0 : i32, i32
  }
  func.func @transform_4(%arg0: i32) -> (i32, i32) {
    %c0_i32 = arith.constant 0 : i32
    %c0_i32_0 = arith.constant 0 : i32
    %c0_i32_1 = arith.constant 0 : i32
    return %c0_i32, %c0_i32_0 : i32, i32
  }
  func.func @transform_5(%arg0: i32) -> (i32, i32) {
    %c0_i32 = arith.constant 0 : i32
    %c0_i32_0 = arith.constant 0 : i32
    %c0_i32_1 = arith.constant 0 : i32
    return %c0_i32, %c0_i32_0 : i32, i32
  }
  func.func @transform_6(%arg0: i32) -> (i32, i32) {
    %c0_i32 = arith.constant 0 : i32
    %c0_i32_0 = arith.constant 0 : i32
    %c0_i32_1 = arith.constant 0 : i32
    return %c0_i32, %c0_i32_0 : i32, i32
  }
  func.func @transform_7(%arg0: i32) -> (i32, i32) {
    %c0_i32 = arith.constant 0 : i32
    %c0_i32_0 = arith.constant 0 : i32
    %c0_i32_1 = arith.constant 0 : i32
    return %c0_i32, %c0_i32_0 : i32, i32
  }
  func.func @transform_8(%arg0: i32) -> (i32, i32) {
    %c0_i32 = arith.constant 0 : i32
    %c0_i32_0 = arith.constant 0 : i32
    %c0_i32_1 = arith.constant 0 : i32
    return %c0_i32, %c0_i32_0 : i32, i32
  }
  func.func @transform_9(%arg0: i32) -> (i32, i32) {
    %c0_i32 = arith.constant 0 : i32
    %c0_i32_0 = arith.constant 0 : i32
    %c0_i32_1 = arith.constant 0 : i32
    return %c0_i32, %c0_i32_0 : i32, i32
  }
  func.func @transform_10(%arg0: i32) -> (i32, i32) {
    %c0_i32 = arith.constant 0 : i32
    %c0_i32_0 = arith.constant 0 : i32
    %c0_i32_1 = arith.constant 0 : i32
    return %c0_i32, %c0_i32_0 : i32, i32
  }
  func.func @transform_11(%arg0: i32) -> (i32, i32) {
    %c0_i32 = arith.constant 0 : i32
    %c0_i32_0 = arith.constant 0 : i32
    %c0_i32_1 = arith.constant 0 : i32
    return %c0_i32, %c0_i32_0 : i32, i32
  }
  func.func @transform_12(%arg0: i32) -> (i32, i32) {
    %c0_i32 = arith.constant 0 : i32
    %c0_i32_0 = arith.constant 0 : i32
    %c0_i32_1 = arith.constant 0 : i32
    return %c0_i32, %c0_i32_0 : i32, i32
  }
  func.func @transform_13(%arg0: i32) -> (i32, i32, i32) {
    %c0_i32 = arith.constant 0 : i32
    %c0_i32_0 = arith.constant 0 : i32
    %c0_i32_1 = arith.constant 0 : i32
    return %arg0, %c0_i32, %c0_i32_0 : i32, i32, i32
  }
  func.func @transform_14(%arg0: i32) -> (i32, i32, i32) {
    %c0_i32 = arith.constant 0 : i32
    %c0_i32_0 = arith.constant 0 : i32
    %c0_i32_1 = arith.constant 0 : i32
    return %arg0, %c0_i32, %c0_i32_0 : i32, i32, i32
  }
}

</mosaic_0001>

<bundles_post_ra>
// kernel: tpu_custom_call.1
= control target key start
LH: loop header
LB: loop body
LE: loop exit
PB: predicated region body
PF: predicated region fallthrough
CT: control target
= control target key end

     0   :  { %s5661_s0 = inlined_call_operand.vmem [shape: bf16[2,16,128], index: 0, kind: input, shape index: {}]   ;;  %s5662_s1 = inlined_call_operand.vmem [shape: bf16[2,16,16], index: 1, kind: input, shape index: {}]   ;;  %s5663_s2 = inlined_call_operand.vmem [shape: f32[2,16,1], index: 2, kind: input, shape index: {}]   ;;  %s5664_s3 = inlined_call_operand.vmem [shape: bf16[128,512], index: 3, kind: input, shape index: {}]   ;;  %s5665_s4 = inlined_call_operand.hbm [shape: f32[1,512], index: 4, kind: input, shape index: {}]   ;;  %s5666_s5 = inlined_call_operand.hbm [shape: bf16[512,512], index: 5, kind: input, shape index: {}]   ;;  %s5667_s6 = inlined_call_operand.hbm [shape: f32[1,512], index: 6, kind: input, shape index: {}]   ;;  %s5668_s7 = inlined_call_operand.hbm [shape: f32[1,512], index: 7, kind: input, shape index: {}]   ;;  %s5669_s8 = inlined_call_operand.hbm [shape: f32[1,512], index: 8, kind: input, shape index: {}]   ;;  %s5670_s9 = inlined_call_operand.hbm [shape: bf16[512,512], index: 9, kind: input, shape index: {}]   ;;  %s5671_s10 = inlined_call_operand.vmem [shape: f32[1,512], index: 10, kind: input, shape index: {}]   ;;  %s5672_s11 = inlined_call_operand.vmem [shape: f32[16,256], index: 11, kind: input, shape index: {}]   ;;  %s5673_s12 = inlined_call_operand.vmem [shape: f32[256,16], index: 12, kind: input, shape index: {}]   ;;  %s5674_s13 = inlined_call_operand.hbm [shape: f32[2,1,512], index: 13, kind: output, shape index: {0}]   ;;  %s5675_s14 = inlined_call_operand.hbm [shape: f32[2,16,16], index: 14, kind: output, shape index: {1}]  }
   0x1   :  { %5691 = sst [smem:[#allocation29_spill]] %s5672_s11 }
   0x2   :  { %5692 = sst [smem:[#allocation30_spill]] %s5674_s13 }
   0x3   :  { %5693 = sst [smem:[#allocation31_spill]] %s5675_s14 }
   0x4   :  { %20 = vsyncpa [#allocation3], 0 }
   0x5   :  { %21 = vsyncpa [#allocation6], 0 }
   0x6   :  { %22 = vsyncpa [#allocation9], 0 }
   0x7   :  { %23 = vsyncpa [#allocation12], 0 }
   0x8   :  { %24 = vsyncpa [#allocation4], 0 }
   0x9   :  { %26 = vsyncpa [#allocation4 + $0x1], 0 }
   0xa   :  { %27 = vsyncpa [#allocation15], 0 }
   0xb   :  { %29 = vsyncpa [#allocation15 + $0x1], 0  ;;  %s5016_s29 = smov 0   ;;  %s5018_s30 = smov 0  }
   0xc   :  { %s5020_s15 = smov 0   ;;  %s5022_s16 = smov 0  }
   0xd LB: > { %5694 = sst [smem:[#allocation22_spill]] %s4913_s29  ;;  %s5037_s17 = sadd.s32 4294967295, %s4925_s16   ;;  %s4925_s16 = sphi %s5022_s16, %s5725_s16   ;;  %s4921_s15 = sphi %s5020_s15, %s5727_s15   ;;  %s4917_s30 = sphi %s5018_s30, %s5729_s30   ;;  %s4913_s29 = sphi %s5016_s29, %s5728_s29  }
   0xe   : > { %5695 = sst [smem:[#allocation23_spill]] %s4921_s15  ;;  %s3640_s18 = sadd.s32 4294967294, %s4925_s16  }
   0xf   : > { %5696 = sst [smem:[#allocation24_spill]] %s4925_s16  ;;  %s5041_s19 = sadd.s32 1, %s4925_s16  }
  0x10   : > { %5697 = sst [smem:[#allocation25_spill]] %s5041_s19  ;;  %s330_s20 = sadd.s32 1, %s4921_s15 }
  0x11   : > { %s327_s21 = ssub.s32 %s4925_s16, %s5041_s19  ;;  %p340_p0 = scmp.ne.s32.totalorder %s4921_s15, %s4917_s30 }
  0x12   : > { %p328_p1 = scmp.eq.s32.totalorder %s327_s21, 0  ;;  %p341_p2 = scmp.eq.s32.totalorder %s5037_s17, 1 }
  0x13   : > { %p346_p3 = scmp.ne.s32.totalorder %s4917_s30, %s4913_s29  ;;  %p347_p4 = scmp.eq.s32.totalorder %s3640_s18, 1 }
  0x14   : > { %s5052_s22 = scalar_select %p328_p1, %s4921_s15, %s330_s20  }
  0x15   : > { %p5054_p5 = por %p341_p2, %p340_p0  ;;  %p5058_p6 = por %p347_p4, %p346_p3 }
  0x16   : > { %5698 = sst [smem:[#allocation26_spill]] %s5052_s22  ;;  %p3641_p7 = scmp.ge.s32.totalorder %s4925_s16, 1 }
  0x17   : > { %s5699_s23 = scalar_select %p5054_p5, 1, 0 }
  0x18   : > { %s5701_s24 = scalar_select %p5058_p6, 1, 0 }
  0x19   : > { %5700 = sst [smem:[#allocation27_spill]] %s5699_s23  ;;  %p380_p8 = scmp.lt.s32.totalorder %s4925_s16, 3 }
  0x1a   : > { %5702 = sst [smem:[#allocation28_spill]] %s5701_s24  ;;  %p5682_p9 = scmp.eq.s32.totalorder %s5037_s17, 0 }
  0x1b   : > { %p5065_p10 = pnand %p3641_p7, %p380_p8  ;;  %s4927_s26 = smov [#allocation5]  }
  0x1c   : > { %s406_s27 = sshll.u32 %s4927_s26, 4  ;;  %s4928_s18 = smov [#allocation8]   ;;  %s5071_s27 = int_to_ptr.vmem [resolvable:$true] %s406_s27 }
  0x1d   : > { %s5703_s25 = scalar_select %p5065_p10, 1, 0 }
  0x1e   : > { %p4120_p11 = pneg %p5065_p10  ;;  %s431_s20 = sshll.u32 %s4928_s18, 4  ;;  %s5079_s20 = int_to_ptr.vmem [resolvable:$true] %s431_s20 }
  0x1f   : > { %s4929_s21 = smov [#allocation2]   ;;  %s4647_s26 = scalar_lea.hbm %s5666_s5, 16384 }
  0x20   : > { %p5075_p12 = pnand %p5682_p9, %p4120_p11  ;;  %s5081_s22 = sshll.u32 %s4929_s21, 4  ;;  %s397_s22 = int_to_ptr.vmem [resolvable:$true] %s5081_s22 }
  0x21   : > { %p4648_p13 = scmp.ne.s32.totalorder %s5666_s5, %s4647_s26  ;;  %p4654_p3 = scmp.lt.u32.totalorder %s4647_s26, %s5666_s5 }
  0x22   : > { %p5091_p0 = pneg %p5075_p12 }
  0x24   : > { %p4650_p1 = pnand %p5091_p0, %p4648_p13 }
  0x26   : > { %p4651_p2 = pneg %p4650_p1 }
  0x28   : > { %p4656_p4 = pnand %p4654_p3, %p4651_p2 }
  0x2a   : > { %4659 = shalt.err (!%p4656_p4)
}
  0x2b   : > { %s4660_s29 = scalar_lea.vmem %s5071_s27, 16384  ;;  %p4668_p9 = scmp.lt.s32.totalorder %s5071_s27, %s5071_s27 }
  0x2c   : > { %p4661_p7 = scmp.ne.s32.totalorder %s5071_s27, %s4660_s29  ;;  %p4669_p6 = scmp.lt.s32.totalorder %s4660_s29, %s4660_s29 }
  0x2e   : > { %p4663_p8 = pnand %p4661_p7, %p5091_p0  ;;  %p4670_p13 = por %p4669_p6, %p4668_p9 }
  0x30   : > { %p4664_p11 = pneg %p4663_p8 }
  0x32   : > { %p4671_p1 = pnand %p4670_p13, %p4664_p11 }
  0x34   : > { %4674 = shalt.err (!%p4671_p1)
}
  0x35   : > { %s5690_s15 = smov 256   ;;  %s4931_s19 = smov 16  }
  0x36   : > { %4126 = dma.hbm_to_vmem [thread:$0]  (!%p5075_p12), %s5666_s5, 16384, %s5071_s27, [#allocation6], %s5690_s15, %s5690_s15, %s4931_s19  }
  0x37   : > { %s4675_s29 = scalar_lea.hbm %s5668_s7, 64 }
  0x38   : > { %p4676_p6 = scmp.ne.s32.totalorder %s5668_s7, %s4675_s29  ;;  %p4682_p3 = scmp.lt.u32.totalorder %s4675_s29, %s5668_s7 }
  0x3a   : > { %p4678_p9 = pnand %p4676_p6, %p5091_p0 }
  0x3c   : > { %p4679_p2 = pneg %p4678_p9 }
  0x3e   : > { %p4684_p4 = pnand %p4682_p3, %p4679_p2 }
  0x40   : > { %4687 = shalt.err (!%p4684_p4)
}
  0x41   : > { %s4688_s27 = scalar_lea.vmem %s5079_s20, 64  ;;  %p4696_p13 = scmp.lt.s32.totalorder %s5079_s20, %s5079_s20 }
  0x42   : > { %p4689_p7 = scmp.ne.s32.totalorder %s5079_s20, %s4688_s27  ;;  %p4697_p1 = scmp.lt.s32.totalorder %s4688_s27, %s4688_s27 }
  0x44   : > { %p4691_p8 = pnand %p4689_p7, %p5091_p0  ;;  %p4698_p6 = por %p4697_p1, %p4696_p13 }
  0x46   : > { %p4692_p11 = pneg %p4691_p8 }
  0x48   : > { %p4699_p9 = pnand %p4698_p6, %p4692_p11 }
  0x4a   : > { %4702 = shalt.err (!%p4699_p9)
}
  0x4b   : > { %4132 = dma.hbm_to_vmem [thread:$0]  (!%p5075_p12), %s5668_s7, 64, %s5079_s20, [#allocation9]  }
  0x4c   : > { %s4703_s24 = scalar_lea.hbm %s5665_s4, 64 }
  0x4d   : > { %p4704_p2 = scmp.ne.s32.totalorder %s5665_s4, %s4703_s24  ;;  %p4710_p7 = scmp.lt.u32.totalorder %s4703_s24, %s5665_s4 }
  0x4f   : > { %p4706_p3 = pnand %p4704_p2, %p5091_p0 }
  0x51   : > { %p4707_p4 = pneg %p4706_p3 }
  0x53   : > { %p4712_p8 = pnand %p4710_p7, %p4707_p4 }
  0x55   : > { %4715 = shalt.err (!%p4712_p8)
}
  0x56   : > { %s4716_s27 = scalar_lea.vmem %s397_s22, 64  ;;  %p4724_p6 = scmp.lt.s32.totalorder %s397_s22, %s397_s22 }
  0x57   : > { %p4717_p11 = scmp.ne.s32.totalorder %s397_s22, %s4716_s27  ;;  %p4725_p9 = scmp.lt.s32.totalorder %s4716_s27, %s4716_s27 }
  0x59   : > { %p4719_p13 = pnand %p4717_p11, %p5091_p0  ;;  %p4726_p5 = por %p4725_p9, %p4724_p6 }
  0x5b   : > { %p4720_p1 = pneg %p4719_p13 }
  0x5d   : > { %p4727_p10 = pnand %p4726_p5, %p4720_p1 }
  0x5f   : > { %4730 = shalt.err (!%p4727_p10)
}
  0x60   : > { %4123 = dma.hbm_to_vmem [thread:$0]  (!%p5075_p12), %s5665_s4, 64, %s397_s22, [#allocation3]  }
  0x61   : > { %s4932_s13 = smov [#allocation7]   ;;  %s4933_s23 = smov [#allocation10]  }
  0x62   : > { %s420_s14 = sshll.u32 %s4932_s13, 4  ;;  %s442_s24 = sshll.u32 %s4933_s23, 4  ;;  %s421_s14 = int_to_ptr.vmem [resolvable:$true] %s420_s14  ;;  %s443_s24 = int_to_ptr.vmem [resolvable:$true] %s442_s24 }
  0x63   : > { %s4731_s21 = scalar_lea.hbm %s5667_s6, 64 }
  0x64   : > { %p4732_p5 = scmp.ne.s32.totalorder %s5667_s6, %s4731_s21  ;;  %p4738_p3 = scmp.lt.u32.totalorder %s4731_s21, %s5667_s6 }
  0x66   : > { %p4734_p10 = pnand %p4732_p5, %p5091_p0 }
  0x68   : > { %p4735_p2 = pneg %p4734_p10 }
  0x6a   : > { %p4740_p4 = pnand %p4738_p3, %p4735_p2 }
  0x6c   : > { %4743 = shalt.err (!%p4740_p4)
}
  0x6d   : > { %s4744_s22 = scalar_lea.vmem %s421_s14, 64  ;;  %p4752_p13 = scmp.lt.s32.totalorder %s421_s14, %s421_s14 }
  0x6e   : > { %p4745_p7 = scmp.ne.s32.totalorder %s421_s14, %s4744_s22  ;;  %p4753_p1 = scmp.lt.s32.totalorder %s4744_s22, %s4744_s22 }
  0x70   : > { %p4747_p8 = pnand %p4745_p7, %p5091_p0  ;;  %p4754_p6 = por %p4753_p1, %p4752_p13 }
  0x72   : > { %p4748_p11 = pneg %p4747_p8 }
  0x74   : > { %p4755_p9 = pnand %p4754_p6, %p4748_p11 }
  0x76   : > { %4758 = shalt.err (!%p4755_p9)
}
  0x77   : > { %4129 = dma.hbm_to_vmem [thread:$0]  (!%p5075_p12), %s5667_s6, 64, %s421_s14, [#allocation6]  }
  0x78   : > { %s4759_s26 = scalar_lea.hbm %s5669_s8, 64 }
  0x79   : > { %p4760_p5 = scmp.ne.s32.totalorder %s5669_s8, %s4759_s26  ;;  %p4766_p3 = scmp.lt.u32.totalorder %s4759_s26, %s5669_s8 }
  0x7b   : > { %p4762_p10 = pnand %p4760_p5, %p5091_p0 }
  0x7d   : > { %p4763_p2 = pneg %p4762_p10 }
  0x7f   : > { %p4768_p4 = pnand %p4766_p3, %p4763_p2 }
  0x81   : > { %4771 = shalt.err (!%p4768_p4)
}
  0x82   : > { %s4772_s20 = scalar_lea.vmem %s443_s24, 64  ;;  %p4780_p13 = scmp.lt.s32.totalorder %s443_s24, %s443_s24 }
  0x83   : > { %p4773_p7 = scmp.ne.s32.totalorder %s443_s24, %s4772_s20  ;;  %p4781_p1 = scmp.lt.s32.totalorder %s4772_s20, %s4772_s20 }
  0x85   : > { %p4775_p8 = pnand %p4773_p7, %p5091_p0  ;;  %p4782_p6 = por %p4781_p1, %p4780_p13 }
  0x87   : > { %p4776_p11 = pneg %p4775_p8 }
  0x89   : > { %p4783_p9 = pnand %p4782_p6, %p4776_p11 }
  0x8b   : > { %4786 = shalt.err (!%p4783_p9)
}
  0x8c   : > { %4135 = dma.hbm_to_vmem [thread:$0]  (!%p5075_p12), %s5669_s8, 64, %s443_s24, [#allocation9]  }
  0x8d   : > { %s4934_s11 = smov [#allocation11]   ;;  %s4787_s26 = scalar_lea.hbm %s5670_s9, 16384 }
  0x8e   : > { %s452_s13 = sshll.u32 %s4934_s11, 4  ;;  %p4788_p5 = scmp.ne.s32.totalorder %s5670_s9, %s4787_s26  ;;  %s453_s13 = int_to_ptr.vmem [resolvable:$true] %s452_s13 }
  0x8f   : > { %p4794_p3 = scmp.lt.u32.totalorder %s4787_s26, %s5670_s9 }
  0x90   : > { %p4790_p10 = pnand %p4788_p5, %p5091_p0 }
  0x92   : > { %p4791_p2 = pneg %p4790_p10 }
  0x94   : > { %p4796_p4 = pnand %p4794_p3, %p4791_p2 }
  0x96   : > { %4799 = shalt.err (!%p4796_p4)
}
  0x97   : > { %s4800_s24 = scalar_lea.vmem %s453_s13, 16384  ;;  %p4808_p13 = scmp.lt.s32.totalorder %s453_s13, %s453_s13 }
  0x98   : > { %p4801_p7 = scmp.ne.s32.totalorder %s453_s13, %s4800_s24  ;;  %p4809_p1 = scmp.lt.s32.totalorder %s4800_s24, %s4800_s24 }
  0x9a   : > { %p4803_p8 = pnand %p4801_p7, %p5091_p0  ;;  %p4810_p6 = por %p4809_p1, %p4808_p13 }
  0x9c   : > { %p4804_p11 = pneg %p4803_p8 }
  0x9e   : > { %p4811_p9 = pnand %p4810_p6, %p4804_p11 }
  0xa0   : > { %4814 = shalt.err (!%p4811_p9)
}
  0xa1   : > { %s5706_s20 = smov 256   ;;  %p5707_p5 = scmp.ne.s32.totalorder %s5703_s25, 0 }
  0xa2   : > { %4138 = dma.hbm_to_vmem [thread:$0]  (!%p5075_p12), %s5670_s9, 16384, %s453_s13, [#allocation12], %s5706_s20, %s5706_s20, %s4931_s19  }
  0xa3   : > { %501 = sbr.rel (%p5707_p5) target bundleno = 1956 (0x7a4), region = 72  ;;  %p5708_p0 = scmp.eq.s32.totalorder (!%p5707_p5), %s5037_s17, 0 }
  0xaa   : > { %4888 = dma.done.wait (%p5708_p0), [#allocation3], 64   ;;  %p5709_p10 = pmov %p5708_p0 }
  0xab   : > { %p5710_p2 = pmov %p5708_p0 }
  0xac   : > { %4890 = vsyncadd (%p5709_p10), [#allocation3], 4294967232 }
  0xad   : > { %4892 = dma.done.wait (%p5710_p2), [#allocation6], 16448   ;;  %p5711_p3 = pmov %p5708_p0 }
  0xae   : > { %p5712_p4 = pmov %p5708_p0 }
  0xaf   : > { %4894 = vsyncadd (%p5711_p3), [#allocation6], 4294950848 }
  0xb0   : > { %4896 = dma.done.wait (%p5712_p4), [#allocation9], 128   ;;  %p5713_p12 = pmov %p5708_p0 }
  0xb1   : > { %p5714_p7 = pmov %p5708_p0 }
  0xb2   : > { %4898 = vsyncadd (%p5713_p12), [#allocation9], 4294967168 }
  0xb3   : > { %4900 = dma.done.wait (%p5714_p7), [#allocation12], 16384   ;;  %p5715_p8 = pmov %p5708_p0 }
  0xb4   : > { %v4935_v0 = vmov 0   ;;  %p582_p11 = scmp.lt.s32.totalorder %s5037_s17, 1  ;;  %v4205_v1 = vld [vmem:[%s5664_s3 + $0x4] ss:$16 sps:$4 sm:$0xff]   ;;  %v4207_v2 = vld [vmem:[%s5664_s3] ss:$16 sps:$4 sm:$0xff]   ;;  %v638_v60 = vlaneseq }
  0xb5   : > { %4902 = vsyncadd (%p5715_p8), [#allocation12], 4294950912  ;;  %856 = vmatprep.mubr.bf16.mxu0 %v4935_v0  ;;  %899 = vmatprep.mubr.bf16.mxu1 %v4935_v0  ;;  %v4208_v3 = vld [vmem:[%s5664_s3 + $0x24] ss:$16 sps:$4 sm:$0xff]   ;;  %v4210_v4 = vld [vmem:[%s5664_s3 + $0x20] ss:$16 sps:$4 sm:$0xff]  }
  0xb6   : > { %4203 = vset.pattern.permute.xlu0 %v4935_v0  ;;  %4204 = vset.pattern.permute.xlu1 %v4935_v0  ;;  %s5250_s26 = scalar_select %p582_p11, %s5037_s17, 1  ;;  %v4211_v5 = vld [vmem:[%s5664_s3 + $0x44] ss:$16 sps:$4 sm:$0xff]   ;;  %v4213_v6 = vld [vmem:[%s5664_s3 + $0x40] ss:$16 sps:$4 sm:$0xff]   ;;  %v5350_v61 = vshrl.u32 %v638_v60, 7 }
  0xb7   : > { %824 = vmatprep.subr.bf16.mxu0 %v4205_v1  ;;  %v4214_v7 = vld [vmem:[%s5664_s3 + $0x64] ss:$16 sps:$4 sm:$0xff]   ;;  %v4216_v8 = vld [vmem:[%s5664_s3 + $0x60] ss:$16 sps:$4 sm:$0xff]   ;;  %v4231_v10 = vld [vmem:[%s5664_s3 + $0xc] ss:$16 sps:$4 sm:$0xff]  }
  0xb8   : > { %825 = vmatpush1.bf16.msra.mxu0 %v4207_v2  ;;  %s3972_s24 = sshll.u32 %s5250_s26, 3  ;;  %v4217_v9 = vld [vmem:[%s5664_s3 + $0x84] ss:$16 sps:$4 sm:$0xff]   ;;  %v4233_v11 = vld [vmem:[%s5664_s3 + $0x8] ss:$16 sps:$4 sm:$0xff]   ;;  %867 = vmatprep.subr.bf16.mxu1 %v4231_v10  ;;  %v5353_v62 = vsub.s32 0, %v5350_v61 }
  0xb9   : > { %826 = vmatprep.subr.bf16.mxu0 %v4208_v3  ;;  %s5265_s25 = scalar_lea.vmem %s5662_s1, %s3972_s24  ;;  %s5273_s15 = scalar_lea.vmem %s5661_s0, %s3972_s24  ;;  %v4234_v12 = vld [vmem:[%s5664_s3 + $0x2c] ss:$16 sps:$4 sm:$0xff]   ;;  %v4219_v13 = vld [vmem:[%s5664_s3 + $0x80] ss:$16 sps:$4 sm:$0xff]   ;;  %v4220_v14 = vld [vmem:[%s5664_s3 + $0xa4] ss:$16 sps:$4 sm:$0xff]   ;;  %868 = vmatpush1.bf16.msra.mxu1 %v4233_v11 }
  0xba   : > { %v4236_v15 = vld [vmem:[%s5664_s3 + $0x28] ss:$16 sps:$4 sm:$0xff]   ;;  %869 = vmatprep.subr.bf16.mxu1 %v4234_v12  ;;  %v4237_v16 = vld [vmem:[%s5664_s3 + $0x4c] ss:$16 sps:$4 sm:$0xff]   ;;  %v4222_v17 = vld [vmem:[%s5664_s3 + $0xa0] ss:$16 sps:$4 sm:$0xff]  }
  0xbb   : > { %v4223_v18 = vld [vmem:[%s5664_s3 + $0xc4] ss:$16 sps:$4 sm:$0xff]   ;;  %v4239_v19 = vld [vmem:[%s5664_s3 + $0x48] ss:$16 sps:$4 sm:$0xff]   ;;  %v4225_v20 = vld [vmem:[%s5664_s3 + $0xc0] ss:$16 sps:$4 sm:$0xff]  }
  0xbc   : > { %827 = vmatpush1.bf16.msra.mxu0 %v4210_v4  ;;  %v4240_v21 = vld [vmem:[%s5664_s3 + $0x6c] ss:$16 sps:$4 sm:$0xff]   ;;  %v4226_v22 = vld [vmem:[%s5664_s3 + $0xe4] ss:$16 sps:$4 sm:$0xff]   ;;  %v4242_v23 = vld [vmem:[%s5664_s3 + $0x68] ss:$16 sps:$4 sm:$0xff]  }
  0xbd   : > { %828 = vmatprep.subr.bf16.mxu0 %v4211_v5  ;;  %870 = vmatpush1.bf16.msra.mxu1 %v4236_v15  ;;  %v4243_v24 = vld [vmem:[%s5664_s3 + $0x8c] ss:$16 sps:$4 sm:$0xff]   ;;  %v4228_v25 = vld [vmem:[%s5664_s3 + $0xe0] ss:$16 sps:$4 sm:$0xff]   ;;  %v4245_v26 = vld [vmem:[%s5664_s3 + $0x88] ss:$16 sps:$4 sm:$0xff]  }
  0xbe   : > { %871 = vmatprep.subr.bf16.mxu1 %v4237_v16  ;;  %v4246_v27 = vld [vmem:[%s5664_s3 + $0xac] ss:$16 sps:$4 sm:$0xff]   ;;  %v4229_v28 = vld [vmem:[%s5273_s15] sm:$0xff]   ;;  %v4248_v29 = vld [vmem:[%s5664_s3 + $0xa8] ss:$16 sps:$4 sm:$0xff]   ;;  %v5356_v1 = vsub.s32 1, %v5350_v61 }
  0xbf   : > { %v4249_v30 = vld [vmem:[%s5664_s3 + $0xcc] ss:$16 sps:$4 sm:$0xff]   ;;  %v4251_v31 = vld [vmem:[%s5664_s3 + $0xc8] ss:$16 sps:$4 sm:$0xff]   ;;  %v4255_v34 = vld [vmem:[#allocation5] ss:$16 sps:$4 sm:$0xff]  }
  0xc0   : > { %829 = vmatpush1.bf16.msra.mxu0 %v4213_v6  ;;  %v4252_v32 = vld [vmem:[%s5664_s3 + $0xec] ss:$16 sps:$4 sm:$0xff]   ;;  %v4254_v33 = vld [vmem:[%s5664_s3 + $0xe8] ss:$16 sps:$4 sm:$0xff]   ;;  %v4261_v37 = vld [vmem:[#allocation5 + $0x20] ss:$16 sps:$4 sm:$0xff]  }
  0xc1   : > { %830 = vmatprep.subr.bf16.mxu0 %v4214_v7  ;;  %872 = vmatpush1.bf16.msra.mxu1 %v4239_v19  ;;  %v4257_v35 = vld [vmem:[#allocation5 + $0x4] ss:$16 sps:$4 sm:$0xff]   ;;  %v4267_v39 = vld [vmem:[#allocation5 + $0x40] ss:$16 sps:$4 sm:$0xff]   ;;  %v636_v63 = vld [vmem:[#allocation2] sm:$0xf] }
  0xc2   : > { %873 = vmatprep.subr.bf16.mxu1 %v4240_v21  ;;  %v4263_v36 = vld [vmem:[#allocation5 + $0x24] ss:$16 sps:$4 sm:$0xff]   ;;  %v4273_v41 = vld [vmem:[#allocation5 + $0x60] ss:$16 sps:$4 sm:$0xff]   ;;  %v641_v2 = vrot.slane %v636_v63, %v5353_v62  ;;  %v645_v4 = vrot.slane %v636_v63, %v5356_v1  ;;  %v5364_v15 = vsub.s32 3, %v5350_v61  ;;  %vm919_vm0 = vcmask 130048  }
  0xc3   : > { %v4269_v38 = vld [vmem:[#allocation5 + $0x44] ss:$16 sps:$4 sm:$0xff]   ;;  %v4279_v43 = vld [vmem:[#allocation5 + $0x80] ss:$16 sps:$4 sm:$0xff]   ;;  %vm2203_vm1 = vcmask 7168   ;;  %s5567_s24 = sand.u32 1, %s4917_s30   ;;  %vm4059_vm3 = vmpackc.low %vm919_vm0, %vm919_vm0 }
  0xc4   : > { %831 = vmatpush1.bf16.msra.mxu0 %v4216_v8  ;;  %v4275_v40 = vld [vmem:[#allocation5 + $0x64] ss:$16 sps:$4 sm:$0xff]   ;;  %v4285_v45 = vld [vmem:[#allocation5 + $0xa0] ss:$16 sps:$4 sm:$0xff]   ;;  %s3656_s13 = sshll.u32 %s5567_s24, 2  ;;  %vm3208_vm2 = vcmp.lt.s32.totalorder %v638_v60, 512 }
  0xc5   : > { %832 = vmatprep.subr.bf16.mxu0 %v4217_v9  ;;  %874 = vmatpush1.bf16.msra.mxu1 %v4242_v23  ;;  %v4281_v42 = vld [vmem:[#allocation5 + $0x84] ss:$16 sps:$4 sm:$0xff]   ;;  %v4291_v47 = vld [vmem:[#allocation5 + $0xc0] ss:$16 sps:$4 sm:$0xff]   ;;  %s574_s21 = scalar_lea.vmem [#allocation13], %s3656_s13  ;;  %s5717_s15 = sld [smem:[#allocation27_spill]] }
  0xc6   : > { %875 = vmatprep.subr.bf16.mxu1 %v4243_v24  ;;  %v4287_v44 = vld [vmem:[#allocation5 + $0xa4] ss:$16 sps:$4 sm:$0xff]   ;;  %v4297_v49 = vld [vmem:[#allocation5 + $0xe0] ss:$16 sps:$4 sm:$0xff]   ;;  %s3975_s29 = sshll.u32 %s5037_s17, 6  ;;  %s3449_s27 = sshll.u32 %s574_s21, 4  ;;  %s3450_s27 = int_to_ptr.vmem [resolvable:$true] %s3449_s27 }
  0xc7   : > { %v4293_v46 = vld [vmem:[#allocation5 + $0xc4] ss:$16 sps:$4 sm:$0xff]   ;;  %v4303_v51 = vld [vmem:[#allocation5 + $0x100] ss:$16 sps:$4 sm:$0xff]   ;;  %s5718_s14 = sld [smem:[#allocation30_spill]]  ;;  %s3430_s16 = scalar_lea.sflag [#allocation4], %s5567_s24 }
  0xc8   : > { %833 = vmatpush1.bf16.msra.mxu0 %v4219_v13  ;;  %v4299_v48 = vld [vmem:[#allocation5 + $0xe4] ss:$16 sps:$4 sm:$0xff]   ;;  %v4309_v53 = vld [vmem:[#allocation5 + $0x120] ss:$16 sps:$4 sm:$0xff]   ;;  %s4815_s28 = scalar_lea.vmem %s3450_s27, 64  ;;  %s4937_s19 = smov [#allocation13]  }
  0xc9   : > { %834 = vmatprep.subr.bf16.mxu0 %v4220_v14  ;;  %876 = vmatpush1.bf16.msra.mxu1 %v4245_v26  ;;  %v4305_v50 = vld [vmem:[#allocation5 + $0x104] ss:$16 sps:$4 sm:$0xff]   ;;  %v4315_v55 = vld [vmem:[#allocation5 + $0x140] ss:$16 sps:$4 sm:$0xff]   ;;  %v5361_v14 = vsub.s32 2, %v5350_v61  ;;  %p4816_p13 = scmp.ne.s32.totalorder %s3450_s27, %s4815_s28  ;;  %s4819_s11 = sshll.u32 %s4937_s19, 4  ;;  %s4820_s11 = int_to_ptr.vmem [resolvable:$false] %s4819_s11 }
  0xca   : > { %877 = vmatprep.subr.bf16.mxu1 %v4246_v27  ;;  %v4311_v52 = vld [vmem:[#allocation5 + $0x124] ss:$16 sps:$4 sm:$0xff]   ;;  %v4321_v57 = vld [vmem:[#allocation5 + $0x160] ss:$16 sps:$4 sm:$0xff]   ;;  %s4821_s13 = scalar_lea.vmem %s4820_s11, 128  ;;  %p4822_p5 = scmp.lt.s32.totalorder %s3450_s27, %s4820_s11 }
  0xcb   : > { %v4317_v54 = vld [vmem:[#allocation5 + $0x144] ss:$16 sps:$4 sm:$0xff]   ;;  %v4327_v59 = vld [vmem:[#allocation5 + $0x180] ss:$16 sps:$4 sm:$0xff]   ;;  %p5719_p1 = scmp.ne.s32.totalorder %s5717_s15, 0  ;;  %p4823_p0 = scmp.lt.s32.totalorder %s4821_s13, %s4815_s28 }
  0xcc   : > { %835 = vmatpush1.bf16.msra.mxu0 %v4222_v17  ;;  %v4323_v56 = vld [vmem:[#allocation5 + $0x164] ss:$16 sps:$4 sm:$0xff]   ;;  %v5367_v16 = vld [vmem:[%s5265_s25] sm:$0xff]   ;;  %v649_v17 = vrot.slane %v636_v63, %v5361_v14  ;;  %s3974_s25 = sshll.u32 %s5250_s26, 4  ;;  %s5716_s26 = sld [smem:[#allocation29_spill]] }
  0xcd   : > { %836 = vmatprep.subr.bf16.mxu0 %v4223_v18  ;;  %878 = vmatpush1.bf16.msra.mxu1 %v4248_v29  ;;  %v4329_v58 = vld [vmem:[#allocation5 + $0x184] ss:$16 sps:$4 sm:$0xff]   ;;  %v653_v18 = vrot.slane %v636_v63, %v5364_v15  ;;  %v4260_v29 = vld [vmem:[#allocation5 + $0xc] ss:$16 sps:$4 sm:$0xff]   ;;  %s596_s22 = scalar_lea.vmem %s5663_s2, %s3974_s25  ;;  %p4817_p6 = pnand %p4816_p13, %p5719_p1 }
  0xce   : > { %879 = vmatprep.subr.bf16.mxu1 %v4249_v30  ;;  %v4258_v30 = vld [vmem:[#allocation5 + $0x8] ss:$16 sps:$4 sm:$0xff]   ;;  %v4344_v63 = vld [vmem:[#allocation5 + $0x1cc] ss:$16 sps:$4 sm:$0xff]   ;;  %p4824_p10 = por %p4823_p0, %p4822_p5 }
  0xcf   : > { %p4818_p9 = pneg %p4817_p6 }
  0xd0   : > { %837 = vmatpush1.bf16.msra.mxu0 %v4225_v20 }
  0xd1   : > { %838 = vmatprep.subr.bf16.mxu0 %v4226_v22  ;;  %880 = vmatpush1.bf16.msra.mxu1 %v4251_v31  ;;  %v4266_v31 = vld [vmem:[#allocation5 + $0x2c] ss:$16 sps:$4 sm:$0xff]   ;;  %p4825_p2 = pnand %p4824_p10, %p4818_p9 }
  0xd2   : > { %881 = vmatprep.subr.bf16.mxu1 %v4252_v32  ;;  %v4264_v32 = vld [vmem:[#allocation5 + $0x28] ss:$16 sps:$4 sm:$0xff]  }
  0xd4   : > { %839 = vmatpush1.bf16.msra.mxu0 %v4228_v25 }
  0xd5   : > { %882 = vmatpush1.bf16.msra.mxu1 %v4254_v33  ;;  %1869 = vmatprep.subr.bf16.mxu0 %v4257_v35  ;;  %v4272_v33 = vld [vmem:[#allocation5 + $0x4c] ss:$16 sps:$4 sm:$0xff]  }
  0xd6   : > { %v4278_v35 = vld [vmem:[#allocation5 + $0x6c] ss:$16 sps:$4 sm:$0xff]  }
  0xd7   : > { %857 = vmatmul.mubr.bf16.vlgmr.msra.gmra.mrb[0].mxu0 %v4229_v28 }
  0xd8   : > { %900 = vmatmul.mubr.bf16.vlgmr.msra.gmra.mrb[0].mxu1 %v4229_v28  ;;  %1870 = vmatpush1.bf16.msra.mxu0 %v4255_v34  ;;  %v4270_v34 = vld [vmem:[#allocation5 + $0x48] ss:$16 sps:$4 sm:$0xff]  }
  0xd9   : > { %955 = vmatprep.mubr.bf16.mxu1 %v4935_v0  ;;  %1871 = vmatprep.subr.bf16.mxu0 %v4263_v36  ;;  %v4276_v36 = vld [vmem:[#allocation5 + $0x68] ss:$16 sps:$4 sm:$0xff]  }
  0xdc   : > { %1872 = vmatpush1.bf16.msra.mxu0 %v4261_v37  ;;  %v4284_v37 = vld [vmem:[#allocation5 + $0x8c] ss:$16 sps:$4 sm:$0xff]  }
  0xdd   : > { %1873 = vmatprep.subr.bf16.mxu0 %v4269_v38  ;;  %v4282_v38 = vld [vmem:[#allocation5 + $0x88] ss:$16 sps:$4 sm:$0xff]  }
  0xe0   : > { %1874 = vmatpush1.bf16.msra.mxu0 %v4267_v39  ;;  %v4290_v39 = vld [vmem:[#allocation5 + $0xac] ss:$16 sps:$4 sm:$0xff]  }
  0xe1   : > { %1875 = vmatprep.subr.bf16.mxu0 %v4275_v40  ;;  %v4288_v40 = vld [vmem:[#allocation5 + $0xa8] ss:$16 sps:$4 sm:$0xff]  }
  0xe4   : > { %1876 = vmatpush1.bf16.msra.mxu0 %v4273_v41  ;;  %v4296_v41 = vld [vmem:[#allocation5 + $0xcc] ss:$16 sps:$4 sm:$0xff]  }
  0xe5   : > { %1877 = vmatprep.subr.bf16.mxu0 %v4281_v42  ;;  %v4294_v42 = vld [vmem:[#allocation5 + $0xc8] ss:$16 sps:$4 sm:$0xff]  }
  0xe8   : > { %1878 = vmatpush1.bf16.msra.mxu0 %v4279_v43  ;;  %v4302_v43 = vld [vmem:[#allocation5 + $0xec] ss:$16 sps:$4 sm:$0xff]  }
  0xe9   : > { %1879 = vmatprep.subr.bf16.mxu0 %v4287_v44  ;;  %v4300_v44 = vld [vmem:[#allocation5 + $0xe8] ss:$16 sps:$4 sm:$0xff]  }
  0xec   : > { %1880 = vmatpush1.bf16.msra.mxu0 %v4285_v45  ;;  %v4308_v45 = vld [vmem:[#allocation5 + $0x10c] ss:$16 sps:$4 sm:$0xff]  }
  0xed   : > { %1881 = vmatprep.subr.bf16.mxu0 %v4293_v46  ;;  %v4306_v46 = vld [vmem:[#allocation5 + $0x108] ss:$16 sps:$4 sm:$0xff]  }
  0xf0   : > { %1882 = vmatpush1.bf16.msra.mxu0 %v4291_v47  ;;  %v4314_v47 = vld [vmem:[#allocation5 + $0x12c] ss:$16 sps:$4 sm:$0xff]  }
  0xf1   : > { %1883 = vmatprep.subr.bf16.mxu0 %v4299_v48  ;;  %v4312_v48 = vld [vmem:[#allocation5 + $0x128] ss:$16 sps:$4 sm:$0xff]  }
  0xf4   : > { %1884 = vmatpush1.bf16.msra.mxu0 %v4297_v49  ;;  %v4320_v49 = vld [vmem:[#allocation5 + $0x14c] ss:$16 sps:$4 sm:$0xff]  }
  0xf5   : > { %1885 = vmatprep.subr.bf16.mxu0 %v4305_v50  ;;  %v4318_v50 = vld [vmem:[#allocation5 + $0x148] ss:$16 sps:$4 sm:$0xff]  }
  0xf8   : > { %1886 = vmatpush1.bf16.msra.mxu0 %v4303_v51  ;;  %v4326_v51 = vld [vmem:[#allocation5 + $0x16c] ss:$16 sps:$4 sm:$0xff]  }
  0xf9   : > { %1887 = vmatprep.subr.bf16.mxu0 %v4311_v52  ;;  %v4324_v52 = vld [vmem:[#allocation5 + $0x168] ss:$16 sps:$4 sm:$0xff]  }
  0xfc   : > { %1888 = vmatpush1.bf16.msra.mxu0 %v4309_v53  ;;  %v4332_v53 = vld [vmem:[#allocation5 + $0x18c] ss:$16 sps:$4 sm:$0xff]  }
  0xfd   : > { %1889 = vmatprep.subr.bf16.mxu0 %v4317_v54  ;;  %v4330_v54 = vld [vmem:[#allocation5 + $0x188] ss:$16 sps:$4 sm:$0xff]  }
 0x100   : > { %1890 = vmatpush1.bf16.msra.mxu0 %v4315_v55  ;;  %v4335_v55 = vld [vmem:[#allocation5 + $0x1a4] ss:$16 sps:$4 sm:$0xff]  }
 0x101   : > { %1891 = vmatprep.subr.bf16.mxu0 %v4323_v56  ;;  %v4338_v56 = vld [vmem:[#allocation5 + $0x1ac] ss:$16 sps:$4 sm:$0xff]  }
 0x104   : > { %1892 = vmatpush1.bf16.msra.mxu0 %v4321_v57  ;;  %v4333_v57 = vld [vmem:[#allocation5 + $0x1a0] ss:$16 sps:$4 sm:$0xff]  }
 0x105   : > { %1893 = vmatprep.subr.bf16.mxu0 %v4329_v58  ;;  %v4336_v58 = vld [vmem:[#allocation5 + $0x1a8] ss:$16 sps:$4 sm:$0xff]  }
 0x108   : > { %1894 = vmatpush1.bf16.msra.mxu0 %v4327_v59  ;;  %v4341_v59 = vld [vmem:[#allocation5 + $0x1c4] ss:$16 sps:$4 sm:$0xff]  }
 0x109   : > { %1895 = vmatprep.subr.bf16.mxu0 %v4335_v55 }
 0x10c   : > { %1896 = vmatpush1.bf16.msra.mxu0 %v4333_v57 }
 0x10d   : > { %1897 = vmatprep.subr.bf16.mxu0 %v4341_v59  ;;  %v4363_v59 = vld [vmem:[#allocation5 + $0x240] ss:$16 sps:$4 sm:$0xff]  }
 0x1aa   : > { %v858_v3 = vpop.f32.mrb[0].mxu0 }
 0x1ab   : > { %v860_v5 = vpop.f32.mrb[1].mxu0  ;;  %v859_v7 = vadd.f32 %v858_v3, %v641_v2  ;;  %v901_v19 = vpop.f32.mrb[0].mxu1  ;;  %v4342_v3 = vld [vmem:[#allocation5 + $0x1c8] ss:$16 sps:$4 sm:$0xff]  }
 0x1ac   : > { %v862_v6 = vpop.f32.mrb[2].mxu0  ;;  %v861_v10 = vadd.f32 %v860_v5, %v645_v4  ;;  %v902_v20 = vadd.f32 %v901_v19, %v649_v17  ;;  %v903_v21 = vpop.f32.mrb[1].mxu1  ;;  %v4350_v5 = vld [vmem:[#allocation5 + $0x1ec] ss:$16 sps:$4 sm:$0xff]  }
 0x1ad   : > { %v863_v8 = vadd.f32 %v862_v6, %v641_v2  ;;  %v864_v9 = vpop.f32.mrb[3].mxu0  ;;  %v904_v22 = vadd.f32 %v903_v21, %v653_v18  ;;  %v905_v23 = vpop.f32.mrb[2].mxu1  ;;  %v4339_v2 = vld [vmem:[#allocation5 + $0x1c0] ss:$16 sps:$4 sm:$0xff]  }
 0x1ae   : > { %v865_v11 = vadd.f32 %v864_v9, %v645_v4  ;;  %v906_v24 = vadd.f32 %v905_v23, %v649_v17  ;;  %v907_v25 = vpop.f32.mrb[3].mxu1  ;;  %1898 = vmatpush1.bf16.msra.mxu0 %v4339_v2  ;;  %v4347_v4 = vld [vmem:[#allocation5 + $0x1e4] ss:$16 sps:$4 sm:$0xff]   ;;  %v4345_v6 = vld [vmem:[#allocation5 + $0x1e0] ss:$16 sps:$4 sm:$0xff]  }
 0x1af   : > { %v910_v12 = vpack.c.bf16 %v863_v8, %v859_v7  ;;  %v908_v26 = vadd.f32 %v907_v25, %v653_v18  ;;  %v4348_v7 = vld [vmem:[#allocation5 + $0x1e8] ss:$16 sps:$4 sm:$0xff]   ;;  %1899 = vmatprep.subr.bf16.mxu0 %v4347_v4  ;;  %v4353_v8 = vld [vmem:[#allocation5 + $0x204] ss:$16 sps:$4 sm:$0xff]   ;;  %v4356_v9 = vld [vmem:[#allocation5 + $0x20c] ss:$16 sps:$4 sm:$0xff]  }
 0x1b0   : > { %v911_v13 = vpack.c.bf16 %v865_v11, %v861_v10  ;;  %v912_v27 = vpack.c.bf16 %v906_v24, %v902_v20  ;;  %v600_v10 = vld [vmem:[#allocation8] sm:$0xf]  ;;  %v601_v11 = vld [vmem:[#allocation10] sm:$0xf] }
 0x1b1   : > { %v913_v28 = vpack.c.bf16 %v908_v26, %v904_v22  ;;  %v5383_v17 = vrot.slane %v601_v11, %v5353_v62  ;;  %v5386_v19 = vrot.slane %v601_v11, %v5356_v1  ;;  %v4371_v4 = vld [vmem:[#allocation5 + $0x264] ss:$16 sps:$4 sm:$0xff]  }
 0x1b2   : > { %923 = vmatprep.subr.bf16.mxu1 %v911_v13  ;;  %1900 = vmatpush1.bf16.msra.mxu0 %v4345_v6  ;;  %v5380_v13 = vrot.slane %v600_v10, %v5356_v1 }
 0x1b3   : > { %924 = vmatpush1.bf16.msra.mxu1 %v910_v12  ;;  %1912 = vmatprep.subr.bf16.mxu0 %v4353_v8  ;;  %v5377_v12 = vrot.slane %v600_v10, %v5353_v62 }
 0x1b4   : > { %966 = vmatprep.subr.bf16.mxu1 %v913_v28 }
 0x1b6   : > { %3698 = vmatmul.mubr.msk.bf16.vlgmr.msra.gmra.mrb[4].mxu1 %vm919_vm0, %v5367_v16 }
 0x1b7   : > { %998 = vmatprep.mubr.bf16.mxu1 %v4935_v0  ;;  %967 = vmatpush1.bf16.msra.mxu1 %v912_v27 }
 0x1b8   : > { %1955 = vmatprep.subr.bf16.mxu1 %v4260_v29 }
 0x1be   : > { %3699 = vmatmul.mubr.msk.bf16.vlgmr.msra.gmra.mrb[8].mxu1 %vm919_vm0, %v5367_v16 }
 0x1bf   : > { %1956 = vmatpush1.bf16.msra.mxu1 %v4258_v30 }
 0x1c0   : > { %1957 = vmatprep.subr.bf16.mxu1 %v4266_v31 }
 0x1c3   : > { %1958 = vmatpush1.bf16.msra.mxu1 %v4264_v32 }
 0x1c4   : > { %1959 = vmatprep.subr.bf16.mxu1 %v4272_v33 }
 0x1c7   : > { %1960 = vmatpush1.bf16.msra.mxu1 %v4270_v34 }
 0x1c8   : > { %1961 = vmatprep.subr.bf16.mxu1 %v4278_v35 }
 0x1cb   : > { %1962 = vmatpush1.bf16.msra.mxu1 %v4276_v36 }
 0x1cc   : > { %1963 = vmatprep.subr.bf16.mxu1 %v4284_v37  ;;  %v4351_v37 = vld [vmem:[#allocation5 + $0x200] ss:$16 sps:$4 sm:$0xff]  }
 0x1cf   : > { %1964 = vmatpush1.bf16.msra.mxu1 %v4282_v38  ;;  %v4354_v38 = vld [vmem:[#allocation5 + $0x208] ss:$16 sps:$4 sm:$0xff]  }
 0x1d0   : > { %1965 = vmatprep.subr.bf16.mxu1 %v4290_v39  ;;  %v5397_v39 = vrot.slane %v600_v10, %v5361_v14 }
 0x1d3   : > { %1966 = vmatpush1.bf16.msra.mxu1 %v4288_v40  ;;  %v4359_v40 = vld [vmem:[#allocation5 + $0x224] ss:$16 sps:$4 sm:$0xff]  }
 0x1d4   : > { %1967 = vmatprep.subr.bf16.mxu1 %v4296_v41  ;;  %v4362_v41 = vld [vmem:[#allocation5 + $0x22c] ss:$16 sps:$4 sm:$0xff]  }
 0x1d7   : > { %1968 = vmatpush1.bf16.msra.mxu1 %v4294_v42  ;;  %v5400_v42 = vrot.slane %v600_v10, %v5364_v15  ;;  %v4369_v10 = vld [vmem:[#allocation5 + $0x260] ss:$16 sps:$4 sm:$0xff]  }
 0x1d8   : > { %1969 = vmatprep.subr.bf16.mxu1 %v4302_v43  ;;  %v5403_v43 = vrot.slane %v601_v11, %v5361_v14 }
 0x1db   : > { %1970 = vmatpush1.bf16.msra.mxu1 %v4300_v44 }
 0x1dc   : > { %1971 = vmatprep.subr.bf16.mxu1 %v4308_v45  ;;  %v5406_v45 = vrot.slane %v601_v11, %v5364_v15  ;;  %v4372_v11 = vld [vmem:[#allocation5 + $0x268] ss:$16 sps:$4 sm:$0xff]  }
 0x1df   : > { %1972 = vmatpush1.bf16.msra.mxu1 %v4306_v46  ;;  %v4357_v46 = vld [vmem:[#allocation5 + $0x220] ss:$16 sps:$4 sm:$0xff]  }
 0x1e0   : > { %1973 = vmatprep.subr.bf16.mxu1 %v4314_v47  ;;  %v4360_v47 = vld [vmem:[#allocation5 + $0x228] ss:$16 sps:$4 sm:$0xff]  }
 0x1e3   : > { %1974 = vmatpush1.bf16.msra.mxu1 %v4312_v48 }
 0x1e4   : > { %1975 = vmatprep.subr.bf16.mxu1 %v4320_v49 }
 0x1e7   : > { %1976 = vmatpush1.bf16.msra.mxu1 %v4318_v50  ;;  %v4365_v50 = vld [vmem:[#allocation5 + $0x244] ss:$16 sps:$4 sm:$0xff]  }
 0x1e8   : > { %1977 = vmatprep.subr.bf16.mxu1 %v4326_v51  ;;  %v4368_v51 = vld [vmem:[#allocation5 + $0x24c] ss:$16 sps:$4 sm:$0xff]  }
 0x1eb   : > { %1978 = vmatpush1.bf16.msra.mxu1 %v4324_v52 }
 0x1ec   : > { %1979 = vmatprep.subr.bf16.mxu1 %v4332_v53 }
 0x1ef   : > { %1980 = vmatpush1.bf16.msra.mxu1 %v4330_v54 }
 0x1f0   : > { %1981 = vmatprep.subr.bf16.mxu1 %v4338_v56 }
 0x1f3   : > { %1982 = vmatpush1.bf16.msra.mxu1 %v4336_v58 }
 0x1f4   : > { %1983 = vmatprep.subr.bf16.mxu1 %v4344_v63  ;;  %v4366_v63 = vld [vmem:[#allocation5 + $0x248] ss:$16 sps:$4 sm:$0xff]  }
 0x1f7   : > { %1984 = vmatpush1.bf16.msra.mxu1 %v4342_v3 }
 0x1f8   : > { %1985 = vmatprep.subr.bf16.mxu1 %v4350_v5  ;;  %v4374_v5 = vld [vmem:[#allocation5 + $0x26c] ss:$16 sps:$4 sm:$0xff]  }
 0x1fb   : > { %1986 = vmatpush1.bf16.msra.mxu1 %v4348_v7 }
 0x1fc   : > { %1998 = vmatprep.subr.bf16.mxu1 %v4356_v9 }
 0x289   : > { %v957_v18 = vpop.f32.mrb[4].mxu1 }
 0x28a   : > { %v1030_v20 = vmul.f32 %v5377_v12, %v957_v18  ;;  %v959_v21 = vpop.f32.mrb[5].mxu1 }
 0x28b   : > { %v1031_v22 = vmul.f32 %v5380_v13, %v959_v21  ;;  %v961_v23 = vpop.f32.mrb[6].mxu1  ;;  %v4380_v21 = vld [vmem:[#allocation5 + $0x28c] ss:$16 sps:$4 sm:$0xff]  }
 0x28c   : > { %v1059_v24 = vadd.f32 %v5383_v17, %v1030_v20  ;;  %v1034_v25 = vmul.f32 %v5377_v12, %v961_v23  ;;  %v963_v26 = vpop.f32.mrb[7].mxu1  ;;  %v4377_v20 = vld [vmem:[#allocation5 + $0x284] ss:$16 sps:$4 sm:$0xff]   ;;  %v4375_v23 = vld [vmem:[#allocation5 + $0x280] ss:$16 sps:$4 sm:$0xff]  }
 0x28d   : > { %v1060_v27 = vadd.f32 %v5386_v19, %v1031_v22  ;;  %v1035_v28 = vmul.f32 %v5380_v13, %v963_v26  ;;  %v4386_v26 = vld [vmem:[#allocation5 + $0x2ac] ss:$16 sps:$4 sm:$0xff]  }
 0x28e   : > { %v1063_v29 = vadd.f32 %v5383_v17, %v1034_v25  ;;  %v1067_v31 = vmax.f32 %v1059_v24, 0.0  ;;  %v4378_v24 = vld [vmem:[#allocation5 + $0x288] ss:$16 sps:$4 sm:$0xff]   ;;  %v4383_v25 = vld [vmem:[#allocation5 + $0x2a4] ss:$16 sps:$4 sm:$0xff]  }
 0x28f   : > { %v1064_v30 = vadd.f32 %v5386_v19, %v1035_v28  ;;  %v1068_v33 = vmax.f32 %v1060_v27, 0.0  ;;  %v4381_v27 = vld [vmem:[#allocation5 + $0x2a0] ss:$16 sps:$4 sm:$0xff]   ;;  %v4384_v28 = vld [vmem:[#allocation5 + $0x2a8] ss:$16 sps:$4 sm:$0xff]  }
 0x290   : > { %v1071_v32 = vmax.f32 %v1063_v29, 0.0  ;;  %v4389_v29 = vld [vmem:[#allocation5 + $0x2c4] ss:$16 sps:$4 sm:$0xff]  }
 0x291   : > { %v1072_v34 = vmax.f32 %v1064_v30, 0.0  ;;  %v1000_v44 = vpop.f32.mrb[8].mxu1  ;;  %v4392_v30 = vld [vmem:[#allocation5 + $0x2cc] ss:$16 sps:$4 sm:$0xff]  }
 0x292   : > { %v1075_v35 = vpack.c.bf16 %v1071_v32, %v1067_v31  ;;  %v1032_v48 = vmul.f32 %v5397_v39, %v1000_v44  ;;  %v1002_v49 = vpop.f32.mrb[9].mxu1  ;;  %v4387_v31 = vld [vmem:[#allocation5 + $0x2c0] ss:$16 sps:$4 sm:$0xff]   ;;  %v4390_v32 = vld [vmem:[#allocation5 + $0x2c8] ss:$16 sps:$4 sm:$0xff]  }
 0x293   : > { %v1076_v36 = vpack.c.bf16 %v1072_v34, %v1068_v33  ;;  %v1033_v52 = vmul.f32 %v5400_v42, %v1002_v49  ;;  %v1004_v53 = vpop.f32.mrb[10].mxu1  ;;  %v4395_v33 = vld [vmem:[#allocation5 + $0x2e4] ss:$16 sps:$4 sm:$0xff]   ;;  %v4398_v34 = vld [vmem:[#allocation5 + $0x2ec] ss:$16 sps:$4 sm:$0xff]  }
 0x294   : > { %v1061_v54 = vadd.f32 %v5403_v43, %v1032_v48  ;;  %v1036_v55 = vmul.f32 %v5397_v39, %v1004_v53  ;;  %v1006_v56 = vpop.f32.mrb[11].mxu1  ;;  %v4407_v44 = vld [vmem:[#allocation5 + $0x324] ss:$16 sps:$4 sm:$0xff]   ;;  %v4408_v48 = vld [vmem:[#allocation5 + $0x328] ss:$16 sps:$4 sm:$0xff]  }
 0x295   : > { %1901 = vmatprep.mubr.bf16.mxu0 %v1076_v36  ;;  %1987 = vmatprep.mubr.bf16.mxu1 %v1076_v36  ;;  %v1062_v57 = vadd.f32 %v5406_v45, %v1033_v52  ;;  %v1037_v58 = vmul.f32 %v5400_v42, %v1006_v56  ;;  %v4396_v36 = vld [vmem:[#allocation5 + $0x2e8] ss:$16 sps:$4 sm:$0xff]   ;;  %v4413_v49 = vld [vmem:[#allocation5 + $0x344] ss:$16 sps:$4 sm:$0xff]  }
 0x296   : > { %1902 = vmatmul.mubr.bf16.vlgmr.msra.gmra.mrb[4].mxu0 %v1075_v35  ;;  %1988 = vmatmul.mubr.bf16.vlgmr.msra.gmra.mrb[12].mxu1 %v1075_v35  ;;  %v1069_v2 = vmax.f32 %v1061_v54, 0.0  ;;  %v1065_v3 = vadd.f32 %v5403_v43, %v1036_v55  ;;  %v4393_v35 = vld [vmem:[#allocation5 + $0x2e0] ss:$16 sps:$4 sm:$0xff]   ;;  %v4414_v52 = vld [vmem:[#allocation5 + $0x348] ss:$16 sps:$4 sm:$0xff]  }
 0x297   : > { %1913 = vmatpush1.bf16.msra.mxu0 %v4351_v37  ;;  %1999 = vmatpush1.bf16.msra.mxu1 %v4354_v38  ;;  %v1070_v6 = vmax.f32 %v1062_v57, 0.0  ;;  %v1066_v7 = vadd.f32 %v5406_v45, %v1037_v58  ;;  %v4401_v37 = vld [vmem:[#allocation5 + $0x304] ss:$16 sps:$4 sm:$0xff]   ;;  %v4404_v38 = vld [vmem:[#allocation5 + $0x30c] ss:$16 sps:$4 sm:$0xff]  }
 0x298   : > { %1914 = vmatprep.subr.bf16.mxu0 %v4359_v40  ;;  %2000 = vmatprep.subr.bf16.mxu1 %v4362_v41  ;;  %v1073_v8 = vmax.f32 %v1065_v3, 0.0  ;;  %v4399_v40 = vld [vmem:[#allocation5 + $0x300] ss:$16 sps:$4 sm:$0xff]   ;;  %v4402_v41 = vld [vmem:[#allocation5 + $0x308] ss:$16 sps:$4 sm:$0xff]  }
 0x299   : > { %v1074_v9 = vmax.f32 %v1066_v7, 0.0  ;;  %v4419_v53 = vld [vmem:[#allocation5 + $0x364] ss:$16 sps:$4 sm:$0xff]   ;;  %v4422_v54 = vld [vmem:[#allocation5 + $0x36c] ss:$16 sps:$4 sm:$0xff]  }
 0x29a   : > { %v5416_v18 = vpack.c.bf16 %v1073_v8, %v1069_v2  ;;  %v4417_v55 = vld [vmem:[#allocation5 + $0x360] ss:$16 sps:$4 sm:$0xff]   ;;  %v4420_v56 = vld [vmem:[#allocation5 + $0x368] ss:$16 sps:$4 sm:$0xff]   ;;  %v4425_v57 = vld [vmem:[#allocation5 + $0x384] ss:$16 sps:$4 sm:$0xff]  }
 0x29b   : > { %1915 = vmatpush1.bf16.msra.mxu0 %v4357_v46  ;;  %2001 = vmatpush1.bf16.msra.mxu1 %v4360_v47  ;;  %v1078_v22 = vpack.c.bf16 %v1074_v9, %v1070_v6  ;;  %v4410_v46 = vld [vmem:[#allocation5 + $0x32c] ss:$16 sps:$4 sm:$0xff]   ;;  %v4405_v47 = vld [vmem:[#allocation5 + $0x320] ss:$16 sps:$4 sm:$0xff]   ;;  %v4431_v2 = vld [vmem:[#allocation5 + $0x3a4] ss:$16 sps:$4 sm:$0xff]  }
 0x29c   : > { %1916 = vmatprep.subr.bf16.mxu0 %v4365_v50  ;;  %2002 = vmatprep.subr.bf16.mxu1 %v4368_v51  ;;  %v4416_v50 = vld [vmem:[#allocation5 + $0x34c] ss:$16 sps:$4 sm:$0xff]   ;;  %v4411_v51 = vld [vmem:[#allocation5 + $0x340] ss:$16 sps:$4 sm:$0xff]   ;;  %v4437_v6 = vld [vmem:[#allocation5 + $0x3c4] ss:$16 sps:$4 sm:$0xff]  }
 0x29d   : > { %1944 = vmatprep.mubr.bf16.mxu0 %v1078_v22  ;;  %2030 = vmatprep.mubr.bf16.mxu1 %v1078_v22  ;;  %v4428_v58 = vld [vmem:[#allocation5 + $0x38c] ss:$16 sps:$4 sm:$0xff]   ;;  %v4435_v8 = vld [vmem:[#allocation5 + $0x3c0] ss:$16 sps:$4 sm:$0xff]   ;;  %v4438_v9 = vld [vmem:[#allocation5 + $0x3c8] ss:$16 sps:$4 sm:$0xff]  }
 0x29e   : > { %v4434_v3 = vld [vmem:[#allocation5 + $0x3ac] ss:$16 sps:$4 sm:$0xff]  }
 0x29f   : > { %1917 = vmatpush1.bf16.msra.mxu0 %v4363_v59  ;;  %2003 = vmatpush1.bf16.msra.mxu1 %v4366_v63  ;;  %v4423_v59 = vld [vmem:[#allocation5 + $0x380] ss:$16 sps:$4 sm:$0xff]   ;;  %v4426_v63 = vld [vmem:[#allocation5 + $0x388] ss:$16 sps:$4 sm:$0xff]   ;;  %v4440_v7 = vld [vmem:[#allocation5 + $0x3cc] ss:$16 sps:$4 sm:$0xff]  }
 0x2a0   : > { %1918 = vmatprep.subr.bf16.mxu0 %v4371_v4  ;;  %2004 = vmatprep.subr.bf16.mxu1 %v4374_v5  ;;  %v4429_v4 = vld [vmem:[#allocation5 + $0x3a0] ss:$16 sps:$4 sm:$0xff]   ;;  %v4432_v5 = vld [vmem:[#allocation5 + $0x3a8] ss:$16 sps:$4 sm:$0xff]   ;;  %v4447_v22 = vld [vmem:[#allocation11] ss:$16 sps:$4 sm:$0xff]  }
 0x2a3   : > { %1919 = vmatpush1.bf16.msra.mxu0 %v4369_v10  ;;  %2005 = vmatpush1.bf16.msra.mxu1 %v4372_v11  ;;  %v4443_v10 = vld [vmem:[#allocation5 + $0x3e4] ss:$16 sps:$4 sm:$0xff]   ;;  %v4446_v11 = vld [vmem:[#allocation5 + $0x3ec] ss:$16 sps:$4 sm:$0xff]  }
 0x2a4   : > { %1920 = vmatprep.subr.bf16.mxu0 %v4377_v20  ;;  %2006 = vmatprep.subr.bf16.mxu1 %v4380_v21  ;;  %v4441_v20 = vld [vmem:[#allocation5 + $0x3e0] ss:$16 sps:$4 sm:$0xff]   ;;  %v4444_v21 = vld [vmem:[#allocation5 + $0x3e8] ss:$16 sps:$4 sm:$0xff]  }
 0x2a7   : > { %1921 = vmatpush1.bf16.msra.mxu0 %v4375_v23  ;;  %2007 = vmatpush1.bf16.msra.mxu1 %v4378_v24  ;;  %v4449_v23 = vld [vmem:[#allocation11 + $0x4] ss:$16 sps:$4 sm:$0xff]  }
 0x2a8   : > { %1922 = vmatprep.subr.bf16.mxu0 %v4383_v25  ;;  %2008 = vmatprep.subr.bf16.mxu1 %v4386_v26  ;;  %v2155_v24 = vld [vmem:[%s596_s22] sm:$0xff]  ;;  %v2156_v25 = vld [vmem:[%s596_s22 + $0x8] sm:$0xff]  ;;  %s5589_s22 = scalar_lea.hbm %s5718_s14, %s3975_s29 }
 0x2a9   : > { %v4455_v26 = vld [vmem:[#allocation11 + $0x24] ss:$16 sps:$4 sm:$0xff]   ;;  %2159 = vperm.xlu0 %4203, %v2155_v24  }
 0x2ab   : > { %1923 = vmatpush1.bf16.msra.mxu0 %v4381_v27  ;;  %2009 = vmatpush1.bf16.msra.mxu1 %v4384_v28  ;;  %v2204_v27 = vsel %vm2203_vm1, %v2155_v24, 0.0  ;;  %v2205_v28 = vsel %vm2203_vm1, %v2156_v25, 0.0  ;;  %v4458_v24 = vld [vmem:[#allocation11 + $0x2c] ss:$16 sps:$4 sm:$0xff]  }
 0x2ac   : > { %1924 = vmatprep.subr.bf16.mxu0 %v4389_v29  ;;  %2010 = vmatprep.subr.bf16.mxu1 %v4392_v30  ;;  %v4453_v29 = vld [vmem:[#allocation11 + $0x20] ss:$16 sps:$4 sm:$0xff]   ;;  %v4461_v30 = vld [vmem:[#allocation11 + $0x44] ss:$16 sps:$4 sm:$0xff]  }
 0x2ad   : > { %2164 = vperm.xlu0 %4203, %v2156_v25   ;;  %v4456_v25 = vld [vmem:[#allocation11 + $0x28] ss:$16 sps:$4 sm:$0xff]  }
 0x2af   : > { %1925 = vmatpush1.bf16.msra.mxu0 %v4387_v31  ;;  %2011 = vmatpush1.bf16.msra.mxu1 %v4390_v32  ;;  %v4459_v31 = vld [vmem:[#allocation11 + $0x40] ss:$16 sps:$4 sm:$0xff]   ;;  %v4467_v32 = vld [vmem:[#allocation11 + $0x64] ss:$16 sps:$4 sm:$0xff]  }
 0x2b0   : > { %1926 = vmatprep.subr.bf16.mxu0 %v4395_v33  ;;  %2012 = vmatprep.subr.bf16.mxu1 %v4398_v34  ;;  %v4465_v33 = vld [vmem:[#allocation11 + $0x60] ss:$16 sps:$4 sm:$0xff]   ;;  %v4473_v34 = vld [vmem:[#allocation11 + $0x84] ss:$16 sps:$4 sm:$0xff]  }
 0x2b3   : > { %1927 = vmatpush1.bf16.msra.mxu0 %v4393_v35  ;;  %2013 = vmatpush1.bf16.msra.mxu1 %v4396_v36  ;;  %v4471_v35 = vld [vmem:[#allocation11 + $0x80] ss:$16 sps:$4 sm:$0xff]   ;;  %v4479_v36 = vld [vmem:[#allocation11 + $0xa4] ss:$16 sps:$4 sm:$0xff]  }
 0x2b4   : > { %1928 = vmatprep.subr.bf16.mxu0 %v4401_v37  ;;  %2014 = vmatprep.subr.bf16.mxu1 %v4404_v38  ;;  %v4477_v37 = vld [vmem:[#allocation11 + $0xa0] ss:$16 sps:$4 sm:$0xff]   ;;  %v4485_v38 = vld [vmem:[#allocation11 + $0xc4] ss:$16 sps:$4 sm:$0xff]  }
 0x2b7   : > { %1929 = vmatpush1.bf16.msra.mxu0 %v4399_v40  ;;  %2015 = vmatpush1.bf16.msra.mxu1 %v4402_v41  ;;  %v4483_v40 = vld [vmem:[#allocation11 + $0xc0] ss:$16 sps:$4 sm:$0xff]   ;;  %v4491_v41 = vld [vmem:[#allocation11 + $0xe4] ss:$16 sps:$4 sm:$0xff]  }
 0x2b8   : > { %1930 = vmatprep.subr.bf16.mxu0 %v4407_v44  ;;  %2016 = vmatprep.subr.bf16.mxu1 %v4410_v46  ;;  %v4489_v44 = vld [vmem:[#allocation11 + $0xe0] ss:$16 sps:$4 sm:$0xff]   ;;  %v4497_v46 = vld [vmem:[#allocation11 + $0x104] ss:$16 sps:$4 sm:$0xff]  }
 0x2bb   : > { %1931 = vmatpush1.bf16.msra.mxu0 %v4405_v47  ;;  %2017 = vmatpush1.bf16.msra.mxu1 %v4408_v48  ;;  %v4495_v47 = vld [vmem:[#allocation11 + $0x100] ss:$16 sps:$4 sm:$0xff]   ;;  %v1207_v48 = vld [vmem:[#allocation7] sm:$0xf] }
 0x2bc   : > { %1932 = vmatprep.subr.bf16.mxu0 %v4413_v49  ;;  %2018 = vmatprep.subr.bf16.mxu1 %v4416_v50  ;;  %v1212_v49 = vrot.slane %v1207_v48, %v5353_v62  ;;  %v1220_v50 = vrot.slane %v1207_v48, %v5361_v14 }
 0x2bf   : > { %1933 = vmatpush1.bf16.msra.mxu0 %v4411_v51  ;;  %2019 = vmatpush1.bf16.msra.mxu1 %v4414_v52 }
 0x2c0   : > { %1934 = vmatprep.subr.bf16.mxu0 %v4419_v53  ;;  %2020 = vmatprep.subr.bf16.mxu1 %v4422_v54  ;;  %v1216_v53 = vrot.slane %v1207_v48, %v5356_v1  ;;  %v1224_v54 = vrot.slane %v1207_v48, %v5364_v15  ;;  %v4507_v48 = vld [vmem:[#allocation11 + $0x140] ss:$16 sps:$4 sm:$0xff]  }
 0x2c3   : > { %1935 = vmatpush1.bf16.msra.mxu0 %v4417_v55  ;;  %2021 = vmatpush1.bf16.msra.mxu1 %v4420_v56 }
 0x2c4   : > { %1936 = vmatprep.subr.bf16.mxu0 %v4425_v57  ;;  %2022 = vmatprep.subr.bf16.mxu1 %v4428_v58 }
 0x2c7   : > { %1937 = vmatpush1.bf16.msra.mxu0 %v4423_v59  ;;  %2023 = vmatpush1.bf16.msra.mxu1 %v4426_v63 }
 0x2c8   : > { %1938 = vmatprep.subr.bf16.mxu0 %v4431_v2  ;;  %2024 = vmatprep.subr.bf16.mxu1 %v4434_v3 }
 0x2cb   : > { %1939 = vmatpush1.bf16.msra.mxu0 %v4429_v4  ;;  %2025 = vmatpush1.bf16.msra.mxu1 %v4432_v5 }
 0x2cc   : > { %1940 = vmatprep.subr.bf16.mxu0 %v4437_v6  ;;  %2026 = vmatprep.subr.bf16.mxu1 %v4440_v7 }
 0x2cf   : > { %1941 = vmatpush1.bf16.msra.mxu0 %v4435_v8  ;;  %2027 = vmatpush1.bf16.msra.mxu1 %v4438_v9 }
 0x2d0   : > { %1942 = vmatprep.subr.bf16.mxu0 %v4443_v10  ;;  %2028 = vmatprep.subr.bf16.mxu1 %v4446_v11 }
 0x2d3   : > { %1943 = vmatpush1.bf16.msra.mxu0 %v4441_v20  ;;  %2029 = vmatpush1.bf16.msra.mxu1 %v4444_v21 }
 0x2d4   : > { %3013 = vmatprep.subr.bf16.mxu0 %v4449_v23  ;;  %v4450_v23 = vld [vmem:[#allocation11 + $0x8] ss:$16 sps:$4 sm:$0xff]  }
 0x2d6   : > { %1945 = vmatmul.mubr.bf16.vlgmr.msra.gmra.mrb[4].mxu0 %v5416_v18  ;;  %2031 = vmatmul.mubr.bf16.vlgmr.msra.gmra.mrb[12].mxu1 %v5416_v18  ;;  %v5425_v18 = vadd.f32 %v2205_v28, %v2204_v27  ;;  %v4462_v27 = vld [vmem:[#allocation11 + $0x48] ss:$16 sps:$4 sm:$0xff]   ;;  %v4470_v28 = vld [vmem:[#allocation11 + $0x6c] ss:$16 sps:$4 sm:$0xff]  }
 0x2d7   : > { %2077 = vmatprep.mubr.bf16.mxu1 %v4935_v0  ;;  %3014 = vmatpush1.bf16.msra.mxu0 %v4447_v22  ;;  %v4452_v22 = vld [vmem:[#allocation11 + $0xc] ss:$16 sps:$4 sm:$0xff]  }
 0x2d8   : > { %3015 = vmatprep.subr.bf16.mxu0 %v4455_v26  ;;  %v4464_v26 = vld [vmem:[#allocation11 + $0x4c] ss:$16 sps:$4 sm:$0xff]  }
 0x2db   : > { %3016 = vmatpush1.bf16.msra.mxu0 %v4453_v29  ;;  %v4468_v29 = vld [vmem:[#allocation11 + $0x68] ss:$16 sps:$4 sm:$0xff]  }
 0x2dc   : > { %3017 = vmatprep.subr.bf16.mxu0 %v4461_v30  ;;  %v4476_v30 = vld [vmem:[#allocation11 + $0x8c] ss:$16 sps:$4 sm:$0xff]  }
 0x2df   : > { %3018 = vmatpush1.bf16.msra.mxu0 %v4459_v31  ;;  %v4482_v31 = vld [vmem:[#allocation11 + $0xac] ss:$16 sps:$4 sm:$0xff]  }
 0x2e0   : > { %3019 = vmatprep.subr.bf16.mxu0 %v4467_v32  ;;  %v4480_v32 = vld [vmem:[#allocation11 + $0xa8] ss:$16 sps:$4 sm:$0xff]  }
 0x2e3   : > { %3020 = vmatpush1.bf16.msra.mxu0 %v4465_v33  ;;  %v4486_v33 = vld [vmem:[#allocation11 + $0xc8] ss:$16 sps:$4 sm:$0xff]  }
 0x2e4   : > { %3021 = vmatprep.subr.bf16.mxu0 %v4473_v34  ;;  %v4494_v34 = vld [vmem:[#allocation11 + $0xec] ss:$16 sps:$4 sm:$0xff]  }
 0x2e7   : > { %3022 = vmatpush1.bf16.msra.mxu0 %v4471_v35  ;;  %v4492_v35 = vld [vmem:[#allocation11 + $0xe8] ss:$16 sps:$4 sm:$0xff]  }
 0x2e8   : > { %3023 = vmatprep.subr.bf16.mxu0 %v4479_v36  ;;  %v4500_v36 = vld [vmem:[#allocation11 + $0x10c] ss:$16 sps:$4 sm:$0xff]  }
 0x2eb   : > { %3024 = vmatpush1.bf16.msra.mxu0 %v4477_v37  ;;  %v4498_v37 = vld [vmem:[#allocation11 + $0x108] ss:$16 sps:$4 sm:$0xff]  }
 0x2ec   : > { %3025 = vmatprep.subr.bf16.mxu0 %v4485_v38  ;;  %v4503_v38 = vld [vmem:[#allocation11 + $0x124] ss:$16 sps:$4 sm:$0xff]  }
 0x2ef   : > { %3026 = vmatpush1.bf16.msra.mxu0 %v4483_v40  ;;  %v4506_v40 = vld [vmem:[#allocation11 + $0x12c] ss:$16 sps:$4 sm:$0xff]  }
 0x2f0   : > { %3027 = vmatprep.subr.bf16.mxu0 %v4491_v41  ;;  %v4501_v41 = vld [vmem:[#allocation11 + $0x120] ss:$16 sps:$4 sm:$0xff]  }
 0x2f3   : > { %3028 = vmatpush1.bf16.msra.mxu0 %v4489_v44  ;;  %v4504_v44 = vld [vmem:[#allocation11 + $0x128] ss:$16 sps:$4 sm:$0xff]  }
 0x2f4   : > { %3029 = vmatprep.subr.bf16.mxu0 %v4497_v46  ;;  %v4509_v46 = vld [vmem:[#allocation11 + $0x144] ss:$16 sps:$4 sm:$0xff]  }
 0x2f7   : > { %3030 = vmatpush1.bf16.msra.mxu0 %v4495_v47  ;;  %v4512_v47 = vld [vmem:[#allocation11 + $0x14c] ss:$16 sps:$4 sm:$0xff]  }
 0x2f8   : > { %3031 = vmatprep.subr.bf16.mxu0 %v4503_v38 }
 0x2fb   : > { %3032 = vmatpush1.bf16.msra.mxu0 %v4501_v41 }
 0x2fc   : > { %3033 = vmatprep.subr.bf16.mxu0 %v4509_v46 }
 0x2ff   : > { %3034 = vmatpush1.bf16.msra.mxu0 %v4507_v48 }
 0x3a9   : > { %v1946_v51 = vpop.f32.mrb[4].mxu0  ;;  %v2032_v52 = vpop.f32.mrb[12].mxu1 }
 0x3aa   : > { %v1948_v55 = vpop.f32.mrb[5].mxu0  ;;  %v2034_v56 = vpop.f32.mrb[13].mxu1  ;;  %v4064_v59 = vadd.f32 %v1946_v51, %v1212_v49  ;;  %v4068_v63 = vadd.f32 %v2032_v52, %v1220_v50  ;;  %v4518_v51 = vld [vmem:[#allocation11 + $0x16c] ss:$16 sps:$4 sm:$0xff]   ;;  %v4513_v52 = vld [vmem:[#allocation11 + $0x160] ss:$16 sps:$4 sm:$0xff]  }
 0x3ab   : > { %v1950_v57 = vpop.f32.mrb[6].mxu0  ;;  %v2036_v58 = vpop.f32.mrb[14].mxu1  ;;  %v4065_v6 = vadd.f32 %v1948_v55, %v1216_v53  ;;  %v4069_v7 = vadd.f32 %v2034_v56, %v1224_v54  ;;  %v4524_v55 = vld [vmem:[#allocation11 + $0x18c] ss:$16 sps:$4 sm:$0xff]   ;;  %v4519_v56 = vld [vmem:[#allocation11 + $0x180] ss:$16 sps:$4 sm:$0xff]  }
 0x3ac   : > { %v4066_v2 = vadd.f32 %v1950_v57, %v1212_v49  ;;  %v4070_v3 = vadd.f32 %v2036_v58, %v1220_v50  ;;  %v1952_v4 = vpop.f32.mrb[7].mxu0  ;;  %v2038_v5 = vpop.f32.mrb[15].mxu1  ;;  %v4510_v49 = vld [vmem:[#allocation11 + $0x148] ss:$16 sps:$4 sm:$0xff]   ;;  %v4515_v50 = vld [vmem:[#allocation11 + $0x164] ss:$16 sps:$4 sm:$0xff]  }
 0x3ad   : > { %v4067_v8 = vadd.f32 %v1952_v4, %v1216_v53  ;;  %v4071_v9 = vadd.f32 %v2038_v5, %v1224_v54  ;;  %v4516_v53 = vld [vmem:[#allocation11 + $0x168] ss:$16 sps:$4 sm:$0xff]   ;;  %3035 = vmatprep.subr.bf16.mxu0 %v4515_v50  ;;  %v4521_v54 = vld [vmem:[#allocation11 + $0x184] ss:$16 sps:$4 sm:$0xff]   ;;  %v4536_v4 = vld [vmem:[#allocation11 + $0x1cc] ss:$16 sps:$4 sm:$0xff]  }
 0x3ae   : > { %v2041_v10 = vpack.c.bf16 %v4066_v2, %v4064_v59  ;;  %v2043_v11 = vpack.c.bf16 %v4070_v3, %v4068_v63  ;;  %3036 = vmatpush1.bf16.msra.mxu0 %v4513_v52  ;;  %v4522_v57 = vld [vmem:[#allocation11 + $0x188] ss:$16 sps:$4 sm:$0xff]   ;;  %v4527_v58 = vld [vmem:[#allocation11 + $0x1a4] ss:$16 sps:$4 sm:$0xff]   ;;  %v4530_v59 = vld [vmem:[#allocation11 + $0x1ac] ss:$16 sps:$4 sm:$0xff]  }
 0x3af   : > { %v2042_v20 = vpack.c.bf16 %v4067_v8, %v4065_v6  ;;  %v2044_v21 = vpack.c.bf16 %v4071_v9, %v4069_v7  ;;  %3037 = vmatprep.subr.bf16.mxu0 %v4521_v54  ;;  %v4525_v63 = vld [vmem:[#allocation11 + $0x1a0] ss:$16 sps:$4 sm:$0xff]   ;;  %v4528_v2 = vld [vmem:[#allocation11 + $0x1a8] ss:$16 sps:$4 sm:$0xff]   ;;  %v4533_v3 = vld [vmem:[#allocation11 + $0x1c4] ss:$16 sps:$4 sm:$0xff]  }
 0x3b0   : > { %v4531_v5 = vld [vmem:[#allocation11 + $0x1c0] ss:$16 sps:$4 sm:$0xff]   ;;  %v4534_v6 = vld [vmem:[#allocation11 + $0x1c8] ss:$16 sps:$4 sm:$0xff]   ;;  %v4539_v7 = vld [vmem:[#allocation11 + $0x1e4] ss:$16 sps:$4 sm:$0xff]  }
 0x3b1   : > { %2045 = vmatprep.subr.bf16.mxu1 %v2042_v20  ;;  %v4542_v8 = vld [vmem:[#allocation11 + $0x1ec] ss:$16 sps:$4 sm:$0xff]   ;;  %v4537_v9 = vld [vmem:[#allocation11 + $0x1e0] ss:$16 sps:$4 sm:$0xff]  }
 0x3b2   : > { %2046 = vmatpush1.bf16.msra.mxu1 %v2041_v10  ;;  %3038 = vmatpush1.bf16.msra.mxu0 %v4519_v56  ;;  %v4540_v10 = vld [vmem:[#allocation11 + $0x1e8] ss:$16 sps:$4 sm:$0xff]   ;;  %v4548_v20 = vld [vmem:[#allocation11 + $0x20c] ss:$16 sps:$4 sm:$0xff]  }
 0x3b3   : > { %2088 = vmatprep.subr.bf16.mxu1 %v2044_v21  ;;  %3039 = vmatprep.subr.bf16.mxu0 %v4527_v58  ;;  %v2207_v21 = vrot.slane %v5425_v18, 4 }
 0x3b5   : > { %3828 = vmatmul.mubr.msk.bf16.vlgmr.msra.gmra.mrb[16].mxu1 %vm919_vm0, %v5367_v16 }
 0x3b6   : > { %2089 = vmatpush1.bf16.msra.mxu1 %v2043_v11  ;;  %2120 = vmatprep.mubr.bf16.mxu1 %v4935_v0  ;;  %v4474_v0 = vld [vmem:[#allocation11 + $0x88] ss:$16 sps:$4 sm:$0xff]   ;;  %v4545_v11 = vld [vmem:[#allocation11 + $0x204] ss:$16 sps:$4 sm:$0xff]  }
 0x3b7   : > { %3095 = vmatprep.subr.bf16.mxu1 %v4452_v22  ;;  %3040 = vmatpush1.bf16.msra.mxu0 %v4525_v63  ;;  %v2208_v22 = vadd.f32 %v2207_v21, %v5425_v18 }
 0x3b8   : > { %3041 = vmatprep.subr.bf16.mxu0 %v4533_v3 }
 0x3bb   : > { %3042 = vmatpush1.bf16.msra.mxu0 %v4531_v5 }
 0x3bc   : > { %3043 = vmatprep.subr.bf16.mxu0 %v4539_v7 }
 0x3bd   : > { %3829 = vmatmul.mubr.msk.bf16.vlgmr.msra.gmra.mrb[20].mxu1 %vm919_vm0, %v5367_v16  ;;  %v4488_v16 = vld [vmem:[#allocation11 + $0xcc] ss:$16 sps:$4 sm:$0xff]  }
 0x3be   : > { %3096 = vmatpush1.bf16.msra.mxu1 %v4450_v23  ;;  %v2209_v23 = vrot.slane %v2208_v22, 2 }
 0x3bf   : > { %3097 = vmatprep.subr.bf16.mxu1 %v4458_v24  ;;  %3044 = vmatpush1.bf16.msra.mxu0 %v4537_v9 }
 0x3c0   : > { %3054 = vmatprep.subr.bf16.mxu0 %v4545_v11  ;;  %v2210_v24 = vadd.f32 %v2209_v23, %v2208_v22 }
 0x3c2   : > { %3098 = vmatpush1.bf16.msra.mxu1 %v4456_v25  ;;  %v2211_v25 = vrot.slane %v2210_v24, 1 }
 0x3c3   : > { %3099 = vmatprep.subr.bf16.mxu1 %v4464_v26 }
 0x3c4   : > { %v2212_v26 = vadd.f32 %v2211_v25, %v2210_v24 }
 0x3c6   : > { %3100 = vmatpush1.bf16.msra.mxu1 %v4462_v27  ;;  %2348 = vperm.xlu1 %4204, %v2212_v26  }
 0x3c7   : > { %3101 = vmatprep.subr.bf16.mxu1 %v4470_v28 }
 0x3ca   : > { %3102 = vmatpush1.bf16.msra.mxu1 %v4468_v29 }
 0x3cb   : > { %3103 = vmatprep.subr.bf16.mxu1 %v4476_v30 }
 0x3ce   : > { %3104 = vmatpush1.bf16.msra.mxu1 %v4474_v0 }
 0x3cf   : > { %3105 = vmatprep.subr.bf16.mxu1 %v4482_v31  ;;  %v2160_v31 = vpop.permute.xlu0 %2159 }
 0x3d2   : > { %3106 = vmatpush1.bf16.msra.mxu1 %v4480_v32 }
 0x3d3   : > { %3107 = vmatprep.subr.bf16.mxu1 %v4488_v16 }
 0x3d6   : > { %3108 = vmatpush1.bf16.msra.mxu1 %v4486_v33 }
 0x3d7   : > { %3109 = vmatprep.subr.bf16.mxu1 %v4494_v34 }
 0x3da   : > { %3110 = vmatpush1.bf16.msra.mxu1 %v4492_v35 }
 0x3db   : > { %3111 = vmatprep.subr.bf16.mxu1 %v4500_v36 }
 0x3de   : > { %3112 = vmatpush1.bf16.msra.mxu1 %v4498_v37 }
 0x3df   : > { %3113 = vmatprep.subr.bf16.mxu1 %v4506_v40 }
 0x3e2   : > { %3114 = vmatpush1.bf16.msra.mxu1 %v4504_v44  ;;  %v2165_v44 = vpop.permute.xlu0 %2164 }
 0x3e3   : > { %3115 = vmatprep.subr.bf16.mxu1 %v4512_v47 }
 0x3e6   : > { %3116 = vmatpush1.bf16.msra.mxu1 %v4510_v49 }
 0x3e7   : > { %3117 = vmatprep.subr.bf16.mxu1 %v4518_v51 }
 0x3ea   : > { %3118 = vmatpush1.bf16.msra.mxu1 %v4516_v53 }
 0x3eb   : > { %3119 = vmatprep.subr.bf16.mxu1 %v4524_v55 }
 0x3ee   : > { %3120 = vmatpush1.bf16.msra.mxu1 %v4522_v57 }
 0x3ef   : > { %3121 = vmatprep.subr.bf16.mxu1 %v4530_v59 }
 0x3f2   : > { %3122 = vmatpush1.bf16.msra.mxu1 %v4528_v2 }
 0x3f3   : > { %3123 = vmatprep.subr.bf16.mxu1 %v4536_v4 }
 0x3f6   : > { %3124 = vmatpush1.bf16.msra.mxu1 %v4534_v6 }
 0x3f7   : > { %3125 = vmatprep.subr.bf16.mxu1 %v4542_v8 }
 0x3fa   : > { %3126 = vmatpush1.bf16.msra.mxu1 %v4540_v10 }
 0x3fb   : > { %3136 = vmatprep.subr.bf16.mxu1 %v4548_v20 }
 0x488   : > { %v2079_v27 = vpop.f32.mrb[16].mxu1 }
 0x489   : > { %v2131_v28 = vmul.f32 %v2079_v27, %v5377_v12  ;;  %v2081_v29 = vpop.f32.mrb[17].mxu1 }
 0x48a   : > { %v2132_v30 = vmul.f32 %v2081_v29, %v5380_v13  ;;  %v2083_v0 = vpop.f32.mrb[18].mxu1 }
 0x48b   : > { %v2139_v32 = vadd.f32 %v2131_v28, %v5383_v17  ;;  %v2135_v16 = vmul.f32 %v2083_v0, %v5377_v12  ;;  %v2085_v33 = vpop.f32.mrb[19].mxu1  ;;  %v4546_v0 = vld [vmem:[#allocation11 + $0x208] ss:$16 sps:$4 sm:$0xff]  }
 0x48c   : > { %v2140_v18 = vadd.f32 %v2132_v30, %v5386_v19  ;;  %v2136_v34 = vmul.f32 %v2085_v33, %v5380_v13  ;;  %v4543_v30 = vld [vmem:[#allocation11 + $0x200] ss:$16 sps:$4 sm:$0xff]   ;;  %v4551_v33 = vld [vmem:[#allocation11 + $0x224] ss:$16 sps:$4 sm:$0xff]  }
 0x48d   : > { %v2147_v35 = vmax.f32 %v2139_v32, 0.0  ;;  %v2143_v36 = vadd.f32 %v2135_v16, %v5383_v17 }
 0x48e   : > { %v2148_v37 = vmax.f32 %v2140_v18, 0.0  ;;  %v2144_v38 = vadd.f32 %v2136_v34, %v5386_v19  ;;  %v4549_v34 = vld [vmem:[#allocation11 + $0x220] ss:$16 sps:$4 sm:$0xff]  }
 0x48f   : > { %v2151_v40 = vmax.f32 %v2143_v36, 0.0  ;;  %v2167_v47 = vmul.f32 %v2160_v31, %v2147_v35  ;;  %v4552_v35 = vld [vmem:[#allocation11 + $0x228] ss:$16 sps:$4 sm:$0xff]  }
 0x490   : > { %v2152_v41 = vmax.f32 %v2144_v38, 0.0  ;;  %v2122_v46 = vpop.f32.mrb[20].mxu1  ;;  %v2168_v50 = vmul.f32 %v2160_v31, %v2148_v37  ;;  %v4557_v37 = vld [vmem:[#allocation11 + $0x244] ss:$16 sps:$4 sm:$0xff]   ;;  %v4560_v38 = vld [vmem:[#allocation11 + $0x24c] ss:$16 sps:$4 sm:$0xff]  }
 0x491   : > { %v2171_v48 = vmul.f32 %v2165_v44, %v2151_v40  ;;  %v2133_v49 = vmul.f32 %v2122_v46, %v5397_v39  ;;  %v2124_v12 = vpop.f32.mrb[21].mxu1  ;;  %v4558_v46 = vld [vmem:[#allocation11 + $0x248] ss:$16 sps:$4 sm:$0xff]  }
 0x492   : > { %v2172_v51 = vmul.f32 %v2165_v44, %v2152_v41  ;;  %v2134_v52 = vmul.f32 %v2124_v12, %v5400_v42  ;;  %v2126_v13 = vpop.f32.mrb[22].mxu1  ;;  %v4555_v41 = vld [vmem:[#allocation11 + $0x240] ss:$16 sps:$4 sm:$0xff]   ;;  %v4564_v12 = vld [vmem:[#allocation11 + $0x268] ss:$16 sps:$4 sm:$0xff]  }
 0x493   : > { %v2175_v53 = vadd.f32 %v2171_v48, %v2167_v47  ;;  %v2141_v17 = vadd.f32 %v2133_v49, %v5403_v43  ;;  %v2137_v54 = vmul.f32 %v2126_v13, %v5397_v39  ;;  %v2128_v19 = vpop.f32.mrb[23].mxu1  ;;  %v4563_v47 = vld [vmem:[#allocation11 + $0x264] ss:$16 sps:$4 sm:$0xff]   ;;  %v4566_v48 = vld [vmem:[#allocation11 + $0x26c] ss:$16 sps:$4 sm:$0xff]  }
 0x494   : > { %v2182_v55 = vadd.f32 %v2172_v51, %v2168_v50  ;;  %v2142_v56 = vadd.f32 %v2134_v52, %v5406_v45  ;;  %v2138_v57 = vmul.f32 %v2128_v19, %v5400_v42  ;;  %v4561_v49 = vld [vmem:[#allocation11 + $0x260] ss:$16 sps:$4 sm:$0xff]   ;;  %v4569_v50 = vld [vmem:[#allocation11 + $0x284] ss:$16 sps:$4 sm:$0xff]   ;;  %v4572_v51 = vld [vmem:[#allocation11 + $0x28c] ss:$16 sps:$4 sm:$0xff]  }
 0x495   : > { %v2176_v58 = vrot.slane %v2175_v53, 4  ;;  %v2149_v59 = vmax.f32 %v2141_v17, 0.0  ;;  %v2145_v63 = vadd.f32 %v2137_v54, %v5403_v43  ;;  %v4567_v52 = vld [vmem:[#allocation11 + $0x280] ss:$16 sps:$4 sm:$0xff]   ;;  %v4570_v13 = vld [vmem:[#allocation11 + $0x288] ss:$16 sps:$4 sm:$0xff]  }
 0x496   : > { %v2183_v2 = vrot.slane %v2182_v55, 4  ;;  %v2150_v3 = vmax.f32 %v2142_v56, 0.0  ;;  %v2146_v4 = vadd.f32 %v2138_v57, %v5406_v45  ;;  %v4578_v17 = vld [vmem:[#allocation11 + $0x2ac] ss:$16 sps:$4 sm:$0xff]   ;;  %v4573_v54 = vld [vmem:[#allocation11 + $0x2a0] ss:$16 sps:$4 sm:$0xff]  }
 0x497   : > { %v2177_v5 = vadd.f32 %v2176_v58, %v2175_v53  ;;  %v2153_v6 = vmax.f32 %v2145_v63, 0.0  ;;  %v2169_v39 = vmul.f32 %v2160_v31, %v2149_v59  ;;  %v4575_v53 = vld [vmem:[#allocation11 + $0x2a4] ss:$16 sps:$4 sm:$0xff]   ;;  %v4576_v19 = vld [vmem:[#allocation11 + $0x2a8] ss:$16 sps:$4 sm:$0xff]  }
 0x498   : > { %v2184_v7 = vadd.f32 %v2183_v2, %v2182_v55  ;;  %v2154_v8 = vmax.f32 %v2146_v4, 0.0  ;;  %v2170_v11 = vmul.f32 %v2160_v31, %v2150_v3  ;;  %v4554_v31 = vld [vmem:[#allocation11 + $0x22c] ss:$16 sps:$4 sm:$0xff]   ;;  %v4581_v55 = vld [vmem:[#allocation11 + $0x2c4] ss:$16 sps:$4 sm:$0xff]  }
 0x499   : > { %v2178_v9 = vrot.slane %v2177_v5, 2  ;;  %v2173_v10 = vmul.f32 %v2165_v44, %v2153_v6  ;;  %v4584_v56 = vld [vmem:[#allocation11 + $0x2cc] ss:$16 sps:$4 sm:$0xff]   ;;  %v4579_v57 = vld [vmem:[#allocation11 + $0x2c0] ss:$16 sps:$4 sm:$0xff]  }
 0x49a   : > { %v2174_v20 = vmul.f32 %v2165_v44, %v2154_v8  ;;  %v2185_v21 = vrot.slane %v2184_v7, 2  ;;  %v4582_v58 = vld [vmem:[#allocation11 + $0x2c8] ss:$16 sps:$4 sm:$0xff]   ;;  %v4587_v59 = vld [vmem:[#allocation11 + $0x2e4] ss:$16 sps:$4 sm:$0xff]  }
 0x49b   : > { %v2179_v22 = vadd.f32 %v2178_v9, %v2177_v5  ;;  %v5454_v42 = vadd.f32 %v2173_v10, %v2169_v39  ;;  %v4590_v63 = vld [vmem:[#allocation11 + $0x2ec] ss:$16 sps:$4 sm:$0xff]   ;;  %v4585_v2 = vld [vmem:[#allocation11 + $0x2e0] ss:$16 sps:$4 sm:$0xff]   ;;  %v4588_v3 = vld [vmem:[#allocation11 + $0x2e8] ss:$16 sps:$4 sm:$0xff]  }
 0x49c   : > { %v2196_v23 = vadd.f32 %v2174_v20, %v2170_v11  ;;  %v2186_v24 = vadd.f32 %v2185_v21, %v2184_v7  ;;  %v4593_v4 = vld [vmem:[#allocation11 + $0x304] ss:$16 sps:$4 sm:$0xff]   ;;  %v4596_v5 = vld [vmem:[#allocation11 + $0x30c] ss:$16 sps:$4 sm:$0xff]   ;;  %v4591_v6 = vld [vmem:[#allocation11 + $0x300] ss:$16 sps:$4 sm:$0xff]  }
 0x49d   : > { %v2180_v43 = vrot.slane %v2179_v22, 1  ;;  %v4594_v7 = vld [vmem:[#allocation11 + $0x308] ss:$16 sps:$4 sm:$0xff]   ;;  %v4599_v8 = vld [vmem:[#allocation11 + $0x324] ss:$16 sps:$4 sm:$0xff]  }
 0x49e   : > { %v2197_v25 = vrot.slane %v2196_v23, 4  ;;  %v2187_v26 = vrot.slane %v2186_v24, 1  ;;  %v4602_v9 = vld [vmem:[#allocation11 + $0x32c] ss:$16 sps:$4 sm:$0xff]   ;;  %v4597_v39 = vld [vmem:[#allocation11 + $0x320] ss:$16 sps:$4 sm:$0xff]  }
 0x49f   : > { %v2181_v27 = vadd.f32 %v2180_v43, %v2179_v22  ;;  %v4600_v10 = vld [vmem:[#allocation11 + $0x328] ss:$16 sps:$4 sm:$0xff]   ;;  %v4605_v11 = vld [vmem:[#allocation11 + $0x344] ss:$16 sps:$4 sm:$0xff]   ;;  %v4608_v20 = vld [vmem:[#allocation11 + $0x34c] ss:$16 sps:$4 sm:$0xff]  }
 0x4a0   : > { %v2188_v45 = vadd.f32 %v2187_v26, %v2186_v24  ;;  %v2198_v28 = vadd.f32 %v2197_v25, %v2196_v23  ;;  %v4603_v21 = vld [vmem:[#allocation11 + $0x340] ss:$16 sps:$4 sm:$0xff]   ;;  %v4606_v22 = vld [vmem:[#allocation11 + $0x348] ss:$16 sps:$4 sm:$0xff]   ;;  %v2190_v23 = vrot.slane %v5454_v42, 4 }
 0x4a1   : > { %v2213_v16 = vpack.c.bf16 %v2181_v27, %v2181_v27  ;;  %v4611_v24 = vld [vmem:[#allocation11 + $0x364] ss:$16 sps:$4 sm:$0xff]   ;;  %v4614_v43 = vld [vmem:[#allocation11 + $0x36c] ss:$16 sps:$4 sm:$0xff]   ;;  %v4609_v25 = vld [vmem:[#allocation11 + $0x360] ss:$16 sps:$4 sm:$0xff]  }
 0x4a2   : > { %v2214_v29 = vpack.c.bf16 %v2188_v45, %v2188_v45  ;;  %v2199_v32 = vrot.slane %v2198_v28, 2  ;;  %v4612_v26 = vld [vmem:[#allocation11 + $0x368] ss:$16 sps:$4 sm:$0xff]   ;;  %v2191_v27 = vadd.f32 %v2190_v23, %v5454_v42  ;;  %v4617_v45 = vld [vmem:[#allocation11 + $0x384] ss:$16 sps:$4 sm:$0xff]  }
 0x4a3   : > { %v4629_v42 = vld [vmem:[#allocation11 + $0x3c4] ss:$16 sps:$4 sm:$0xff]  }
 0x4a4   : > { %3045 = vmatprep.mubr.bf16.mxu0 %v2214_v29  ;;  %3127 = vmatprep.mubr.bf16.mxu1 %v2214_v29  ;;  %v2200_v18 = vadd.f32 %v2199_v32, %v2198_v28  ;;  %v4620_v28 = vld [vmem:[#allocation11 + $0x38c] ss:$16 sps:$4 sm:$0xff]   ;;  %v4615_v29 = vld [vmem:[#allocation11 + $0x380] ss:$16 sps:$4 sm:$0xff]   ;;  %v4623_v32 = vld [vmem:[#allocation11 + $0x3a4] ss:$16 sps:$4 sm:$0xff]  }
 0x4a5   : > { %3046 = vmatmul.mubr.bf16.vlgmr.msra.gmra.mrb[8].mxu0 %v2213_v16  ;;  %3128 = vmatmul.mubr.bf16.vlgmr.msra.gmra.mrb[24].mxu1 %v2213_v16  ;;  %v4626_v16 = vld [vmem:[#allocation11 + $0x3ac] ss:$16 sps:$4 sm:$0xff]  }
 0x4a6   : > { %3055 = vmatpush1.bf16.msra.mxu0 %v4543_v30  ;;  %3137 = vmatpush1.bf16.msra.mxu1 %v4546_v0  ;;  %v2201_v36 = vrot.slane %v2200_v18, 1  ;;  %v4618_v30 = vld [vmem:[#allocation11 + $0x388] ss:$16 sps:$4 sm:$0xff]   ;;  %v2192_v0 = vrot.slane %v2191_v27, 2 }
 0x4a7   : > { %3056 = vmatprep.subr.bf16.mxu0 %v4551_v33  ;;  %3138 = vmatprep.subr.bf16.mxu1 %v4554_v31  ;;  %v4621_v33 = vld [vmem:[#allocation11 + $0x3a0] ss:$16 sps:$4 sm:$0xff]   ;;  %v4624_v31 = vld [vmem:[#allocation11 + $0x3a8] ss:$16 sps:$4 sm:$0xff]  }
 0x4a8   : > { %v2202_v40 = vadd.f32 %v2201_v36, %v2200_v18  ;;  %v4632_v18 = vld [vmem:[#allocation11 + $0x3cc] ss:$16 sps:$4 sm:$0xff]   ;;  %v4630_v36 = vld [vmem:[#allocation11 + $0x3c8] ss:$16 sps:$4 sm:$0xff]  }
 0x4aa   : > { %3057 = vmatpush1.bf16.msra.mxu0 %v4549_v34  ;;  %3139 = vmatpush1.bf16.msra.mxu1 %v4552_v35  ;;  %v2216_v44 = vpack.c.bf16 %v2202_v40, %v2202_v40  ;;  %v2193_v34 = vadd.f32 %v2192_v0, %v2191_v27  ;;  %v4627_v35 = vld [vmem:[#allocation11 + $0x3c0] ss:$16 sps:$4 sm:$0xff]  }
 0x4ab   : > { %3058 = vmatprep.subr.bf16.mxu0 %v4557_v37  ;;  %3140 = vmatprep.subr.bf16.mxu1 %v4560_v38  ;;  %v4635_v37 = vld [vmem:[#allocation11 + $0x3e4] ss:$16 sps:$4 sm:$0xff]   ;;  %v4638_v38 = vld [vmem:[#allocation11 + $0x3ec] ss:$16 sps:$4 sm:$0xff]  }
 0x4ac   : > { %3086 = vmatprep.mubr.bf16.mxu0 %v2216_v44  ;;  %3168 = vmatprep.mubr.bf16.mxu1 %v2216_v44  ;;  %v2194_v40 = vrot.slane %v2193_v34, 1  ;;  %v3244_v44 = vld [vmem:[%s5673_s12 + $0x88] sm:$0xff]  ;;  %v3255_v27 = vld [vmem:[%s5673_s12 + $0xe0] sm:$0xff] }
 0x4ae   : > { %3059 = vmatpush1.bf16.msra.mxu0 %v4555_v41  ;;  %3141 = vmatpush1.bf16.msra.mxu1 %v4558_v46  ;;  %v3243_v41 = vld [vmem:[%s5673_s12 + $0x80] sm:$0xff] }
 0x4af   : > { %3060 = vmatprep.subr.bf16.mxu0 %v4563_v47  ;;  %3142 = vmatprep.subr.bf16.mxu1 %v4566_v48  ;;  %v4633_v46 = vld [vmem:[#allocation11 + $0x3e0] ss:$16 sps:$4 sm:$0xff]   ;;  %v4636_v47 = vld [vmem:[#allocation11 + $0x3e8] ss:$16 sps:$4 sm:$0xff]   ;;  %v2195_v48 = vadd.f32 %v2194_v40, %v2193_v34 }
 0x4b0   : > { %v2345_v34 = vld [vmem:[%s5671_s10] sm:$0xf] }
 0x4b2   : > { %3061 = vmatpush1.bf16.msra.mxu0 %v4561_v49  ;;  %3143 = vmatpush1.bf16.msra.mxu1 %v4564_v12  ;;  %v4026_v49 = vpack.c.bf16 %v3244_v44, %v3243_v41  ;;  %v3227_v12 = vld [vmem:[%s5673_s12] sm:$0xff] }
 0x4b3   : > { %3062 = vmatprep.subr.bf16.mxu0 %v4569_v50  ;;  %3144 = vmatprep.subr.bf16.mxu1 %v4572_v51  ;;  %v3228_v50 = vld [vmem:[%s5673_s12 + $0x8] sm:$0xff]  ;;  %v3245_v51 = vld [vmem:[%s5673_s12 + $0x90] sm:$0xff] }
 0x4b6   : > { %3063 = vmatpush1.bf16.msra.mxu0 %v4567_v52  ;;  %3145 = vmatpush1.bf16.msra.mxu1 %v4570_v13  ;;  %v3246_v52 = vld [vmem:[%s5673_s12 + $0x98] sm:$0xff]  ;;  %v4028_v13 = vpack.c.bf16 %v3228_v50, %v3227_v12 }
 0x4b7   : > { %3064 = vmatprep.subr.bf16.mxu0 %v4575_v53  ;;  %3146 = vmatprep.subr.bf16.mxu1 %v4578_v17  ;;  %v2215_v53 = vpack.c.bf16 %v2195_v48, %v2195_v48  ;;  %v4030_v17 = vpack.c.bf16 %v3246_v52, %v3245_v51 }
 0x4ba   : > { %3065 = vmatpush1.bf16.msra.mxu0 %v4573_v54  ;;  %3147 = vmatpush1.bf16.msra.mxu1 %v4576_v19  ;;  %v3229_v54 = vld [vmem:[%s5673_s12 + $0x10] sm:$0xff]  ;;  %v3230_v19 = vld [vmem:[%s5673_s12 + $0x18] sm:$0xff] }
 0x4bb   : > { %3066 = vmatprep.subr.bf16.mxu0 %v4581_v55  ;;  %3148 = vmatprep.subr.bf16.mxu1 %v4584_v56  ;;  %v3247_v55 = vld [vmem:[%s5673_s12 + $0xa0] sm:$0xff]  ;;  %v3248_v56 = vld [vmem:[%s5673_s12 + $0xa8] sm:$0xff] }
 0x4be   : > { %3067 = vmatpush1.bf16.msra.mxu0 %v4579_v57  ;;  %3149 = vmatpush1.bf16.msra.mxu1 %v4582_v58  ;;  %v4032_v57 = vpack.c.bf16 %v3230_v19, %v3229_v54  ;;  %v4034_v58 = vpack.c.bf16 %v3248_v56, %v3247_v55  ;;  %v3211_v56 = vld [vmem:[%s5716_s26] sm:$0xff] }
 0x4bf   : > { %3068 = vmatprep.subr.bf16.mxu0 %v4587_v59  ;;  %3150 = vmatprep.subr.bf16.mxu1 %v4590_v63  ;;  %v3231_v59 = vld [vmem:[%s5673_s12 + $0x20] sm:$0xff]  ;;  %v3232_v63 = vld [vmem:[%s5673_s12 + $0x28] sm:$0xff] }
 0x4c2   : > { %3069 = vmatpush1.bf16.msra.mxu0 %v4585_v2  ;;  %3151 = vmatpush1.bf16.msra.mxu1 %v4588_v3  ;;  %v3249_v2 = vld [vmem:[%s5673_s12 + $0xb0] sm:$0xff]  ;;  %v3250_v3 = vld [vmem:[%s5673_s12 + $0xb8] sm:$0xff] }
 0x4c3   : > { %3070 = vmatprep.subr.bf16.mxu0 %v4593_v4  ;;  %3152 = vmatprep.subr.bf16.mxu1 %v4596_v5  ;;  %v4036_v4 = vpack.c.bf16 %v3232_v63, %v3231_v59  ;;  %v4038_v5 = vpack.c.bf16 %v3250_v3, %v3249_v2  ;;  %v3214_v59 = vld [vmem:[%s5716_s26 + $0x18] sm:$0xff] }
 0x4c6   : > { %3071 = vmatpush1.bf16.msra.mxu0 %v4591_v6  ;;  %3153 = vmatpush1.bf16.msra.mxu1 %v4594_v7  ;;  %v3233_v6 = vld [vmem:[%s5673_s12 + $0x30] sm:$0xff]  ;;  %v3234_v7 = vld [vmem:[%s5673_s12 + $0x38] sm:$0xff] }
 0x4c7   : > { %3072 = vmatprep.subr.bf16.mxu0 %v4599_v8  ;;  %3154 = vmatprep.subr.bf16.mxu1 %v4602_v9  ;;  %v3251_v8 = vld [vmem:[%s5673_s12 + $0xc0] sm:$0xff]  ;;  %v3252_v9 = vld [vmem:[%s5673_s12 + $0xc8] sm:$0xff] }
 0x4ca   : > { %3073 = vmatpush1.bf16.msra.mxu0 %v4597_v39  ;;  %3155 = vmatpush1.bf16.msra.mxu1 %v4600_v10  ;;  %v4040_v39 = vpack.c.bf16 %v3234_v7, %v3233_v6  ;;  %v4042_v10 = vpack.c.bf16 %v3252_v9, %v3251_v8  ;;  %v3213_v7 = vld [vmem:[%s5716_s26 + $0x10] sm:$0xff] }
 0x4cb   : > { %3074 = vmatprep.subr.bf16.mxu0 %v4605_v11  ;;  %3156 = vmatprep.subr.bf16.mxu1 %v4608_v20  ;;  %v3235_v11 = vld [vmem:[%s5673_s12 + $0x40] sm:$0xff]  ;;  %v3236_v20 = vld [vmem:[%s5673_s12 + $0x48] sm:$0xff] }
 0x4cc   : > { %v4044_v23 = vpack.c.bf16 %v3236_v20, %v3235_v11 }
 0x4ce   : > { %3075 = vmatpush1.bf16.msra.mxu0 %v4603_v21  ;;  %3157 = vmatpush1.bf16.msra.mxu1 %v4606_v22  ;;  %v3253_v21 = vld [vmem:[%s5673_s12 + $0xd0] sm:$0xff]  ;;  %v3254_v22 = vld [vmem:[%s5673_s12 + $0xd8] sm:$0xff] }
 0x4cf   : > { %3076 = vmatprep.subr.bf16.mxu0 %v4611_v24  ;;  %3158 = vmatprep.subr.bf16.mxu1 %v4614_v43  ;;  %v4046_v24 = vpack.c.bf16 %v3254_v22, %v3253_v21  ;;  %v3237_v43 = vld [vmem:[%s5673_s12 + $0x50] sm:$0xff] }
 0x4d2   : > { %3077 = vmatpush1.bf16.msra.mxu0 %v4609_v25  ;;  %3159 = vmatpush1.bf16.msra.mxu1 %v4612_v26  ;;  %v3238_v25 = vld [vmem:[%s5673_s12 + $0x58] sm:$0xff] }
 0x4d3   : > { %3078 = vmatprep.subr.bf16.mxu0 %v4617_v45  ;;  %3160 = vmatprep.subr.bf16.mxu1 %v4620_v28  ;;  %v4048_v26 = vpack.c.bf16 %v3238_v25, %v3237_v43  ;;  %v3256_v45 = vld [vmem:[%s5673_s12 + $0xe8] sm:$0xff] }
 0x4d4   : > { %v4050_v28 = vpack.c.bf16 %v3256_v45, %v3255_v27 }
 0x4d6   : > { %3079 = vmatpush1.bf16.msra.mxu0 %v4615_v29  ;;  %3161 = vmatpush1.bf16.msra.mxu1 %v4618_v30  ;;  %v3239_v29 = vld [vmem:[%s5673_s12 + $0x60] sm:$0xff]  ;;  %v3240_v30 = vld [vmem:[%s5673_s12 + $0x68] sm:$0xff] }
 0x4d7   : > { %3080 = vmatprep.subr.bf16.mxu0 %v4623_v32  ;;  %3162 = vmatprep.subr.bf16.mxu1 %v4626_v16  ;;  %v4052_v0 = vpack.c.bf16 %v3240_v30, %v3239_v29  ;;  %v3257_v32 = vld [vmem:[%s5673_s12 + $0xf0] sm:$0xff]  ;;  %v3258_v16 = vld [vmem:[%s5673_s12 + $0xf8] sm:$0xff] }
 0x4da   : > { %3081 = vmatpush1.bf16.msra.mxu0 %v4621_v33  ;;  %3163 = vmatpush1.bf16.msra.mxu1 %v4624_v31  ;;  %v4054_v33 = vpack.c.bf16 %v3258_v16, %v3257_v32  ;;  %v3241_v31 = vld [vmem:[%s5673_s12 + $0x70] sm:$0xff] }
 0x4db   : > { %3082 = vmatprep.subr.bf16.mxu0 %v4629_v42  ;;  %3164 = vmatprep.subr.bf16.mxu1 %v4632_v18  ;;  %v3242_v42 = vld [vmem:[%s5673_s12 + $0x78] sm:$0xff] }
 0x4dc   : > { %v4056_v18 = vpack.c.bf16 %v3242_v42, %v3241_v31 }
 0x4de   : > { %3083 = vmatpush1.bf16.msra.mxu0 %v4627_v35  ;;  %3165 = vmatpush1.bf16.msra.mxu1 %v4630_v36  ;;  %v2349_v35 = vpop.permute.xlu1 %2348 }
 0x4df   : > { %3084 = vmatprep.subr.bf16.mxu0 %v4635_v37  ;;  %3166 = vmatprep.subr.bf16.mxu1 %v4638_v38  ;;  %v2351_v36 = vmul.f32 %v2349_v35, %v2345_v34  ;;  %v4936_v37 = vmov 1966171168  }
 0x4e0   : > { %v3184_v38 = vunpack.c.l.s4 %v4936_v37 }
 0x4e1   : > { %v2996_v40 = vrot.slane %v2351_v36, %v5353_v62  ;;  %v3004_v41 = vrot.slane %v2351_v36, %v5361_v14  ;;  %v3000_v44 = vrot.slane %v2351_v36, %v5356_v1 }
 0x4e2   : > { %3085 = vmatpush1.bf16.msra.mxu0 %v4633_v46  ;;  %3167 = vmatpush1.bf16.msra.mxu1 %v4636_v47  ;;  %v3185_v46 = vunpack.c.0.s8 %v3184_v38  ;;  %v3008_v47 = vrot.slane %v2351_v36, %v5364_v15  ;;  %v3212_v15 = vld [vmem:[%s5716_s26 + $0x8] sm:$0xff] }
 0x4e3   : > { %4027 = vmatprep.subr.bf16.mxu0 %v4026_v49 }
 0x4e5   : > { %3087 = vmatmul.mubr.bf16.vlgmr.msra.gmra.mrb[8].mxu0 %v2215_v53  ;;  %3169 = vmatmul.mubr.bf16.vlgmr.msra.gmra.mrb[24].mxu1 %v2215_v53  ;;  %v3188_v53 = vsub.s32 %v3185_v46, %v5350_v61 }
 0x4e6   : > { %4029 = vmatpush3.bf16.msra.mxu0 %v4028_v13 }
 0x4e7   : > { %4031 = vmatprep.subr.bf16.mxu0 %v4030_v17 }
 0x4ea   : > { %4033 = vmatpush3.bf16.msra.mxu0 %v4032_v57 }
 0x4eb   : > { %4035 = vmatprep.subr.bf16.mxu0 %v4034_v58 }
 0x4ee   : > { %4037 = vmatpush3.bf16.msra.mxu0 %v4036_v4 }
 0x4ef   : > { %4039 = vmatprep.subr.bf16.mxu0 %v4038_v5 }
 0x4f2   : > { %4041 = vmatpush3.bf16.msra.mxu0 %v4040_v39 }
 0x4f3   : > { %4043 = vmatprep.subr.bf16.mxu0 %v4042_v10 }
 0x4f6   : > { %4045 = vmatpush3.bf16.msra.mxu0 %v4044_v23 }
 0x4f7   : > { %4047 = vmatprep.subr.bf16.mxu0 %v4046_v24 }
 0x4fa   : > { %4049 = vmatpush3.bf16.msra.mxu0 %v4048_v26 }
 0x4fb   : > { %4051 = vmatprep.subr.bf16.mxu0 %v4050_v28 }
 0x4fe   : > { %4053 = vmatpush3.bf16.msra.mxu0 %v4052_v0 }
 0x4ff   : > { %4055 = vmatprep.subr.bf16.mxu0 %v4054_v33 }
 0x502   : > { %4057 = vmatpush3.bf16.msra.mxu0 %v4056_v18 }
 0x5b8   : > { %v3088_v48 = vpop.f32.mrb[8].mxu0  ;;  %v3170_v49 = vpop.f32.mrb[24].mxu1 }
 0x5b9   : > { %v4072_v12 = vadd.f32 %v3088_v48, %v2996_v40  ;;  %v4074_v50 = vadd.f32 %v3170_v49, %v3004_v41  ;;  %v3090_v51 = vpop.f32.mrb[9].mxu0  ;;  %v3172_v52 = vpop.f32.mrb[25].mxu1 }
 0x5ba   : > { %v4073_v13 = vadd.f32 %v3090_v51, %v3000_v44  ;;  %v4075_v17 = vadd.f32 %v3172_v52, %v3008_v47  ;;  %v3092_v54 = vpop.f32.mrb[10].mxu0  ;;  %v3174_v19 = vpop.f32.mrb[26].mxu1 }
 0x5bb   : > { %v3218_v14 = vrot.slane %v4072_v12, %v5353_v62  ;;  %v3093_v55 = vpop.f32.mrb[11].mxu0  ;;  %v3175_v1 = vpop.f32.mrb[27].mxu1 }
 0x5bc   : > { %v3181_v57 = vcombine.low %v4072_v12, %v4073_v13  ;;  %v3222_v61 = vrot.slane %v4073_v13, %v5353_v62  ;;  %v3182_v58 = vcombine.low %v4074_v50, %v4075_v17 }
 0x5bd   : > { %v3223_v4 = vmul.f32 %v3218_v14, %v3211_v56  ;;  %v3225_v8 = vmul.f32 %v3218_v14, %v3213_v7 }
 0x5be   : > { %v3189_v63 = vrot.slane %v3181_v57, %v3188_v53  ;;  %v3196_v2 = vrot.slane %v3182_v58, %v3188_v53  ;;  %v3224_v3 = vmul.f32 %v3222_v61, %v3212_v15  ;;  %v3226_v6 = vmul.f32 %v3222_v61, %v3214_v59 }
 0x5c0   : > { %v3197_v5 = vcombine.low %v3189_v63, %v3196_v2  ;;  %3323 = vmatprep.mubr.f32.mxu0 %v3224_v3 }
 0x5c1   : > { %3324 = vmatmul.mubr.f32.vlgmr.msra.gmra.mrb[12].mxu0 %v3223_v4 }
 0x5c2   : > { %v3204_v62 = vrot.slane %v3197_v5, %v3188_v53  ;;  %3328 = vmatprep.mubr.f32.mxu0 %v3226_v6 }
 0x5c4   : > { %3210 = vst.msk [vmem:[%s574_s21] sm:$0xf] %vm3208_vm2, %v3204_v62 }
 0x5c5   : > { %3329 = vmatmul.mubr.f32.gmra.mrb[14].mxu0 %v3225_v8 }
 0x694   : > { %v4009_v9 = vpop.f32.mrb[12].mxu0 }
 0x695   : > { %v4010_v39 = vpop.f32.mrb[13].mxu0 }
 0x696   : > { %v4011_v10 = vadd.f32 %v4010_v39, %v4009_v9 }
 0x698   : > { %v4012_v11 = vpop.f32.mrb[14].mxu0  ;;  %4023 = vmatprep.mubr.msk.f32.mxu1 %vm919_vm0, %v4011_v10 }
 0x699   : > { %v4013_v20 = vpop.f32.mrb[15].mxu0 }
 0x69a   : > { %v4014_v21 = vadd.f32 %v4013_v20, %v4012_v11 }
 0x69c   : > { %v4058_v60 = vpack.c.bf16 %v4014_v21, %v4011_v10 }
 0x69e   : > { %4060 = vmatprep.subr.msk.bf16.mxu1 %vm4059_vm3, %v4058_v60 }
 0x69f   : > { %4063 = vmatpush3.bf16.xpose.msk.msra.mxu1 %vm4059_vm3, %v4058_v60 }
 0x6a6   : > { %4024 = vmatmul.mubr.msk.f32.vlgmr.msra.gmra.mrb[28].mxu1 %vm919_vm0, %v4014_v21 }
 0x6a7   : > { %4828 = shalt.err (!%p4825_p2)
}
 0x6a8   : > { %s4829_s23 = scalar_lea.hbm %s5589_s22, 64  ;;  %s4833_s29 = scalar_lea.hbm %s5718_s14, 128 }
 0x6a9   : > { %p4830_p3 = scmp.ne.s32.totalorder %s5589_s22, %s4829_s23  ;;  %p4834_p7 = scmp.lt.u32.totalorder %s5589_s22, %s5718_s14 }
 0x6aa   : > { %p4835_p8 = scmp.lt.u32.totalorder %s4833_s29, %s4829_s23  ;;  %p4837_p13 = scmp.lt.u32.totalorder %s4829_s23, %s5589_s22 }
 0x6ab   : > { %p4831_p4 = pnand %p4830_p3, %p5719_p1 }
 0x6ac   : > { %p4836_p11 = por %p4835_p8, %p4834_p7 }
 0x6ad   : > { %p4832_p12 = pneg %p4831_p4 }
 0x6ae   : > { %p4838_p6 = por %p4837_p13, %p4836_p11 }
 0x6b0   : > { %p4839_p9 = pnand %p4838_p6, %p4832_p12 }
 0x6b2   : > { %4842 = shalt.err (!%p4839_p9)
}
 0x6b3   : > { %4116 = dma.vmem_to_hbm [thread:$0]  (%p5719_p1), %s3450_s27, 64, %s5589_s22, %s3430_s16  }
 0x6b4   : > { %s3657_s28 = sshll.u32 %s5567_s24, 4  ;;  %s3976_s19 = sshll.u32 %s5037_s17, 8 }
 0x6b5   : > { %s581_s11 = scalar_lea.vmem [#allocation14], %s3657_s28  ;;  %s5720_s22 = sld [smem:[#allocation31_spill]] }
 0x6b6   : > { %s3462_s13 = sshll.u32 %s581_s11, 4  ;;  %s3435_s18 = scalar_lea.sflag [#allocation15], %s5567_s24  ;;  %s5616_s13 = int_to_ptr.vmem [resolvable:$true] %s3462_s13 }
 0x6b7   : > { %s4843_s17 = scalar_lea.vmem %s5616_s13, 256  ;;  %s4938_s21 = smov [#allocation14]  }
 0x6b8   : > { %p4844_p5 = scmp.ne.s32.totalorder %s5616_s13, %s4843_s17  ;;  %s4847_s29 = sshll.u32 %s4938_s21, 4  ;;  %s4848_s29 = int_to_ptr.vmem [resolvable:$false] %s4847_s29 }
 0x6b9   : > { %s4849_s25 = scalar_lea.vmem %s4848_s29, 512  ;;  %p4850_p2 = scmp.lt.s32.totalorder %s5616_s13, %s4848_s29 }
 0x6ba   : > { %p4845_p0 = pnand %p4844_p5, %p5719_p1  ;;  %p4851_p3 = scmp.lt.s32.totalorder %s4849_s25, %s4843_s17 }
 0x6bb   : > { %s5614_s16 = scalar_lea.hbm %s5720_s22, %s3976_s19 }
 0x6bc   : > { %p4846_p10 = pneg %p4845_p0  ;;  %p4852_p4 = por %p4851_p3, %p4850_p2 }
 0x6be   : > { %p4853_p12 = pnand %p4852_p4, %p4846_p10 }
 0x779   : > { %v4025_v22 = vpop.f32.mrb[28].mxu1 }
 0x77a   : > { %v3963_v23 = vmul.f32 -1.442695, %v4025_v22  ;;  %v3406_v24 = vpop.f32.mrb[29].mxu1 }
 0x77b   : > { %v3962_v43 = vmul.f32 -1.442695, %v3406_v24 }
 0x77c   : > { %4639 = vpow2.f32 %v3963_v23 }
 0x77d   : > { %4641 = vpow2.f32 %v3962_v43 }
 0x786   : > { %v4640_v25 = vpop.eup %4639 }
 0x787   : > { %v4642_v26 = vpop.eup %4641  ;;  %v3422_v27 = vadd.f32 1.0, %v4640_v25 }
 0x788   : > { %v3421_v45 = vadd.f32 1.0, %v4642_v26 }
 0x789   : > { %4643 = vrcp.f32 %v3422_v27 }
 0x78a   : > { %4645 = vrcp.f32 %v3421_v45 }
 0x793   : > { %v4644_v28 = vpop.eup %4643 }
 0x794   : > { %v4646_v29 = vpop.eup %4645  ;;  %3428 = vst.msk [vmem:[%s581_s11 + $0x8] sm:$0xff] %vm919_vm0, %v4644_v28 }
 0x795   : > { %3427 = vst.msk [vmem:[%s581_s11] sm:$0xff] %vm919_vm0, %v4646_v29 }
 0x796   : > { %4856 = shalt.err (!%p4853_p12)
}
 0x797   : > { %s4857_s20 = scalar_lea.hbm %s5614_s16, 256  ;;  %s4861_s11 = scalar_lea.hbm %s5720_s22, 512 }
 0x798   : > { %p4858_p7 = scmp.ne.s32.totalorder %s5614_s16, %s4857_s20  ;;  %p4862_p13 = scmp.lt.u32.totalorder %s5614_s16, %s5720_s22 }
 0x799   : > { %p4863_p6 = scmp.lt.u32.totalorder %s4861_s11, %s4857_s20  ;;  %p4865_p5 = scmp.lt.u32.totalorder %s4857_s20, %s5614_s16 }
 0x79a   : > { %p4859_p8 = pnand %p4858_p7, %p5719_p1 }
 0x79b   : > { %p4864_p9 = por %p4863_p6, %p4862_p13 }
 0x79c   : > { %p4860_p11 = pneg %p4859_p8 }
 0x79d   : > { %p4866_p0 = por %p4865_p5, %p4864_p9 }
 0x79f   : > { %p4867_p10 = pnand %p4866_p0, %p4860_p11 }
 0x7a1   : > { %4870 = shalt.err (!%p4867_p10)
}
 0x7a2   : > { %s4939_s17 = smov 128   ;;  %s4940_s21 = smov 8  }
 0x7a3   : > { %4117 = dma.vmem_to_hbm [thread:$0]  (%p5719_p1), %s5616_s13, 256, %s5614_s16, %s3435_s18, %s4939_s17, %s4939_s17, %s4940_s21  }
 0x7a4 PF: > { %s5721_s29 = sld [smem:[#allocation24_spill]]  ;;  %s5722_s25 = sld [smem:[#allocation22_spill]] }
 0x7a5   : > { %s5723_s28 = sld [smem:[#allocation28_spill]] }
 0x7aa   : > { %p4158_p2 = scmp.ge.s32.totalorder %s5721_s29, 2  ;;  %s3477_s19 = sand.u32 1, %s5722_s25  }
 0x7ab   : > { %p5724_p3 = scmp.ne.s32.totalorder %s5723_s28, 0  ;;  %s3478_s20 = scalar_lea.sflag [#allocation4], %s3477_s19 }
 0x7ad   : > { %p4140_p4 = pnand %p4158_p2, %p5724_p3 }
 0x7af   : > { %4904 = dma.done.wait (!%p4140_p4), %s3478_s20, 64  }
 0x7b0   : > { %4906 = vsyncadd (!%p4140_p4), %s3478_s20, 4294967232  ;;  %s3487_s11 = scalar_lea.sflag [#allocation15], %s3477_s19 }
 0x7b1   : > { %4908 = dma.done.wait (!%p4140_p4), %s3487_s11, 256  }
 0x7b2   : > { %4910 = vsyncadd (!%p4140_p4), %s3487_s11, 4294967040  ;;  %s5725_s16 = sld [smem:[#allocation25_spill]]  ;;  %s5726_s23 = sld [smem:[#allocation23_spill]] }
 0x7b3   : > { %s5727_s15 = sld [smem:[#allocation26_spill]]  ;;  %s5728_s29 = smov %s4917_s30 }
 0x7b8   : > { %p32_p1 = scmp.ge.s32.totalorder %s5725_s16, 4   ;;  %s5729_s30 = smov %s5726_s23 }
 0x7ba   :  { %34 = sbr.rel (!%p32_p1) target bundleno = 13 (0xd), region = 155 }
 0x7c1   :  { %3492 = vsyncpa [#allocation3], 1 }
 0x7c2   :  { %3494 = vsyncpa [#allocation3 + $0x1], 1 }
 0x7c3   :  { %3495 = vsyncpa [#allocation6], 1 }
 0x7c4   :  { %3496 = vsyncpa [#allocation9], 1 }
 0x7c5   :  { %3497 = vsyncpa [#allocation12], 1 }
 0x7c6   :  { %3498 = vsyncpa [#allocation4], 1 }
 0x7c7   :  { %3500 = vsyncpa [#allocation4 + $0x1], 1 }
 0x7c8   :  { %3501 = vsyncpa [#allocation15], 1 }
 0x7c9   :  { %3503 = vsyncpa [#allocation15 + $0x1], 1 }

</bundles_post_ra>
